<compile_context>
chip_gen: v7x
topology: tpu7x:2x2x1
jax: 0.10.0
libtpu: 0.0.40
codegen_flags: <defaults>
</compile_context>

<pallas_src>
import functools
import math

import numpy as np
import jax
import jax.numpy as jnp
from jax.experimental import pallas as pl
from jax.experimental.pallas import tpu as pltpu


_CPARAMS = pltpu.CompilerParams(
    dimension_semantics=("parallel",),
    vmem_limit_bytes=32 * 1024 * 1024,
)


def _choose_tm(M, cap=1024):
    """Whole slab when small, else the biggest divisor <= cap that keeps the
    (tile, D) blocks (8,128)-aligned."""
    if M <= cap:
        return M
    for t in (cap, 512, 256, 128, 64, 32, 16, 8):
        if M % t == 0:
            return t
    return M


def _bf16(x):
    return x.astype(jnp.bfloat16)


def _ln(z, g, b, eps=1e-5):
    mu = jnp.mean(z, axis=-1, keepdims=True)
    var = jnp.mean((z - mu) ** 2, axis=-1, keepdims=True)
    return (z - mu) * jax.lax.rsqrt(var + eps) * g + b


# ----------------------------------------------------------------------------
# Kernel 1: fused self-attention block
#   out = norm2(x + OutProj(MHA(x+pos, x+pos, x) [+ additive mask]))
# ----------------------------------------------------------------------------
def _self_attn_block_kernel(x_ref, pos_ref, mask_ref, wqk_ref, bqk_ref, wv_ref,
                            bv_ref, wo_ref, bo_ref, g_ref, be_ref, o_ref, *,
                            num_heads, scale):
    x = x_ref[0]                                   # (Nq, D) f32
    pos = pos_ref[0]
    qk_in = x + pos                                # q/k carry pos, v does not
    # fused Q|K projection (D,2D) and V projection (bf16 MXU, f32 accum)
    qk = jnp.dot(_bf16(qk_in), _bf16(wqk_ref[...]),
                 preferred_element_type=jnp.float32) + bqk_ref[...]
    v = jnp.dot(_bf16(x), _bf16(wv_ref[...]),
                preferred_element_type=jnp.float32) + bv_ref[...]
    D = x.shape[-1]
    hd = D // num_heads
    q = qk[:, :D]
    k = qk[:, D:]
    mask = mask_ref[...]                           # (Nq, Nq) additive, f32
    heads = []
    for h in range(num_heads):                     # static unroll, lane slices
        qh, kh, vh = (t[:, h * hd:(h + 1) * hd] for t in (q, k, v))
        s = jax.lax.dot_general(                   # q @ k^T without explicit .T
            _bf16(qh), _bf16(kh), (((1,), (1,)), ((), ())),
            preferred_element_type=jnp.float32) * scale + mask
        s = s - jnp.max(s, axis=-1, keepdims=True)
        p = jnp.exp(s)
        p = p * pl.reciprocal(jnp.sum(p, axis=-1, keepdims=True), approx=True)
        heads.append(jnp.dot(_bf16(p), _bf16(vh),
                             preferred_element_type=jnp.float32))
    att = jnp.concatenate(heads, axis=-1)          # (Nq, D)
    att = jnp.dot(_bf16(att), _bf16(wo_ref[...]),
                  preferred_element_type=jnp.float32) + bo_ref[...]
    o_ref[0] = _ln(x + att, g_ref[...], be_ref[...])


def self_attn_block(p, norm, query, query_pos, attn_mask, num_heads):
    B, Nq, D = query.shape
    hd = D // num_heads
    if attn_mask is None:
        mask = jnp.zeros((Nq, Nq), jnp.float32)
    elif attn_mask.dtype == jnp.bool_:
        mask = jnp.where(attn_mask, -1e9, 0.0).astype(jnp.float32)
    else:
        mask = attn_mask.astype(jnp.float32)
    # TODO(synk): per-(batch*head) 3-D attn masks are not supported here.
    kernel = functools.partial(_self_attn_block_kernel, num_heads=num_heads,
                               scale=1.0 / math.sqrt(hd))
    return pl.pallas_call(
        kernel,
        out_shape=jax.ShapeDtypeStruct((B, Nq, D), jnp.float32),
        grid=(B,),
        in_specs=[
            pl.BlockSpec((1, Nq, D), lambda b: (b, 0, 0)),
            pl.BlockSpec((1, Nq, D), lambda b: (b, 0, 0)),
            pl.BlockSpec((Nq, Nq), lambda b: (0, 0)),
            pl.BlockSpec((D, 2 * D), lambda b: (0, 0)),
            pl.BlockSpec((1, 2 * D), lambda b: (0, 0)),
            pl.BlockSpec((D, D), lambda b: (0, 0)),
            pl.BlockSpec((1, D), lambda b: (0, 0)),
            pl.BlockSpec((D, D), lambda b: (0, 0)),
            pl.BlockSpec((1, D), lambda b: (0, 0)),
            pl.BlockSpec((1, D), lambda b: (0, 0)),
            pl.BlockSpec((1, D), lambda b: (0, 0)),
        ],
        out_specs=pl.BlockSpec((1, Nq, D), lambda b: (b, 0, 0)),
        compiler_params=_CPARAMS,
    )(query, query_pos, mask,
      p["w_qk"], p["b_qk"].reshape(1, 2 * D),
      p["w_v"], p["b_v"].reshape(1, D),
      p["w_o"], p["b_o"].reshape(1, D),
      norm["g"].reshape(1, D), norm["b"].reshape(1, D))


# ----------------------------------------------------------------------------
# Kernel 2: value projection + key-padding mask (mask broadcast in-kernel)
# ----------------------------------------------------------------------------
def _value_proj_kernel(x_ref, keep_ref, w_ref, b_ref, o_ref):
    y = jnp.dot(_bf16(x_ref[...]), _bf16(w_ref[...]),
                preferred_element_type=jnp.float32) + b_ref[...]
    o_ref[...] = y * keep_ref[...]        # (tm,1) keep-mask, VPU broadcast


def value_proj_masked(p, value, key_padding_mask):
    B, Lv, D = value.shape
    M = B * Lv
    tm = _choose_tm(M)
    if key_padding_mask is None:
        keep = jnp.ones((M, 1), jnp.float32)
    else:
        keep = jnp.logical_not(key_padding_mask).astype(jnp.float32).reshape(M, 1)
    out = pl.pallas_call(
        _value_proj_kernel,
        out_shape=jax.ShapeDtypeStruct((M, D), jnp.float32),
        grid=(M // tm,),
        in_specs=[
            pl.BlockSpec((tm, D), lambda i: (i, 0)),
            pl.BlockSpec((tm, 1), lambda i: (i, 0)),
            pl.BlockSpec((D, D), lambda i: (0, 0)),
            pl.BlockSpec((1, D), lambda i: (0, 0)),
        ],
        out_specs=pl.BlockSpec((tm, D), lambda i: (i, 0)),
        compiler_params=_CPARAMS,
    )(value.reshape(M, D), keep, p["w"], p["b"].reshape(1, D))
    return out.reshape(B, Lv, D)


# ----------------------------------------------------------------------------
# Kernel 3: fused (sampling_offsets | attention_weights) projection + pos-add
# ----------------------------------------------------------------------------
def _posadd_linear_kernel(x_ref, pos_ref, w_ref, b_ref, o_ref):
    xin = x_ref[...] + pos_ref[...]
    o_ref[...] = jnp.dot(_bf16(xin), _bf16(w_ref[...]),
                         preferred_element_type=jnp.float32) + b_ref[...]


def posadd_linear(p, x, pos):
    B, Nq, D = x.shape
    N = p["w"].shape[1]
    M = B * Nq
    tm = _choose_tm(M)
    out = pl.pallas_call(
        _posadd_linear_kernel,
        out_shape=jax.ShapeDtypeStruct((M, N), jnp.float32),
        grid=(M // tm,),
        in_specs=[
            pl.BlockSpec((tm, D), lambda i: (i, 0)),
            pl.BlockSpec((tm, D), lambda i: (i, 0)),
            pl.BlockSpec((D, N), lambda i: (0, 0)),
            pl.BlockSpec((1, N), lambda i: (0, 0)),
        ],
        out_specs=pl.BlockSpec((tm, N), lambda i: (i, 0)),
        compiler_params=_CPARAMS,
    )(x.reshape(M, D), pos.reshape(M, D), p["w"], p["b"].reshape(1, N))
    return out.reshape(B, Nq, N)


# ----------------------------------------------------------------------------
# Kernel 4: output projection + residual + LayerNorm (cross-attn epilogue)
# ----------------------------------------------------------------------------
def _proj_residual_norm_kernel(x_ref, res_ref, w_ref, b_ref, g_ref, be_ref, o_ref):
    y = jnp.dot(_bf16(x_ref[...]), _bf16(w_ref[...]),
                preferred_element_type=jnp.float32) + b_ref[...]
    o_ref[...] = _ln(res_ref[...] + y, g_ref[...], be_ref[...])


def proj_residual_norm(x, residual, proj, norm):
    B, Nq, D = residual.shape
    K = x.shape[-1]
    M = B * Nq
    tm = _choose_tm(M)
    out = pl.pallas_call(
        _proj_residual_norm_kernel,
        out_shape=jax.ShapeDtypeStruct((M, D), jnp.float32),
        grid=(M // tm,),
        in_specs=[
            pl.BlockSpec((tm, K), lambda i: (i, 0)),
            pl.BlockSpec((tm, D), lambda i: (i, 0)),
            pl.BlockSpec((K, D), lambda i: (0, 0)),
            pl.BlockSpec((1, D), lambda i: (0, 0)),
            pl.BlockSpec((1, D), lambda i: (0, 0)),
            pl.BlockSpec((1, D), lambda i: (0, 0)),
        ],
        out_specs=pl.BlockSpec((tm, D), lambda i: (i, 0)),
        compiler_params=_CPARAMS,
    )(x.reshape(M, K), residual.reshape(M, D), proj["w"],
      proj["b"].reshape(1, D), norm["g"].reshape(1, D), norm["b"].reshape(1, D))
    return out.reshape(B, Nq, D)


# ----------------------------------------------------------------------------
# Kernel 5: fused FFN  (linear1 -> ReLU -> linear2 -> +residual -> norm3)
# ----------------------------------------------------------------------------
def _ffn_kernel(x_ref, w1_ref, b1_ref, w2_ref, b2_ref, g_ref, be_ref, o_ref):
    x = x_ref[...]
    h = jnp.maximum(
        jnp.dot(_bf16(x), _bf16(w1_ref[...]),
                preferred_element_type=jnp.float32) + b1_ref[...], 0.0)
    y = jnp.dot(_bf16(h), _bf16(w2_ref[...]),
                preferred_element_type=jnp.float32) + b2_ref[...]
    o_ref[...] = _ln(x + y, g_ref[...], be_ref[...])


def ffn_fused(x, lin1, lin2, norm):
    B, Nq, D = x.shape
    F = lin1["w"].shape[1]
    M = B * Nq
    tm = _choose_tm(M, cap=512)   # cap keeps the (tm, F) hidden tile in VMEM
    out = pl.pallas_call(
        _ffn_kernel,
        out_shape=jax.ShapeDtypeStruct((M, D), jnp.float32),
        grid=(M // tm,),
        in_specs=[
            pl.BlockSpec((tm, D), lambda i: (i, 0)),
            pl.BlockSpec((D, F), lambda i: (0, 0)),
            pl.BlockSpec((1, F), lambda i: (0, 0)),
            pl.BlockSpec((F, D), lambda i: (0, 0)),
            pl.BlockSpec((1, D), lambda i: (0, 0)),
            pl.BlockSpec((1, D), lambda i: (0, 0)),
            pl.BlockSpec((1, D), lambda i: (0, 0)),
        ],
        out_specs=pl.BlockSpec((tm, D), lambda i: (i, 0)),
        compiler_params=_CPARAMS,
    )(x.reshape(M, D), lin1["w"], lin1["b"].reshape(1, F),
      lin2["w"], lin2["b"].reshape(1, D),
      norm["g"].reshape(1, D), norm["b"].reshape(1, D))
    return out.reshape(B, Nq, D)


# ----------------------------------------------------------------------------
# Multi-scale deformable attention (projections in Pallas, gather in JAX)
# ----------------------------------------------------------------------------
def ms_deform_core(value, spatial_shapes, sampling_locations, attention_weights):
    """Bilinear grid-sample + weighted sum (F.grid_sample, align_corners=False,
    padding_mode='zeros')."""
    # TODO(synk): data-dependent bilinear gather has no clean Pallas equivalent.
    B, _, nH, hd = value.shape
    _, Lq, _, L, P, _ = sampling_locations.shape
    splits = [h * w for (h, w) in spatial_shapes]
    offsets = np.cumsum([0] + splits)
    out = jnp.zeros((B, Lq, nH, hd), jnp.float32)
    for lvl, (H_, W_) in enumerate(spatial_shapes):
        v_l = value[:, offsets[lvl]:offsets[lvl + 1]]          # (B, HW, nH, hd)
        v_l = v_l.transpose(0, 2, 1, 3)                        # (B, nH, HW, hd)
        loc = sampling_locations[:, :, :, lvl]                 # (B, Lq, nH, P, 2)
        px = loc[..., 0] * W_ - 0.5
        py = loc[..., 1] * H_ - 0.5
        x0 = jnp.floor(px)
        y0 = jnp.floor(py)
        wx1 = px - x0
        wy1 = py - y0
        wx0 = 1.0 - wx1
        wy0 = 1.0 - wy1
        sampled = jnp.zeros((B, Lq, nH, P, hd), jnp.float32)
        for dy, wy in ((0, wy0), (1, wy1)):
            for dx, wx in ((0, wx0), (1, wx1)):
                xi = x0 + dx
                yi = y0 + dy
                valid = ((xi >= 0) & (xi < W_) & (yi >= 0) & (yi < H_)).astype(
                    jnp.float32)
                xc = jnp.clip(xi, 0, W_ - 1).astype(jnp.int32)
                yc = jnp.clip(yi, 0, H_ - 1).astype(jnp.int32)
                flat = yc * W_ + xc                            # (B, Lq, nH, P)
                idx = flat.transpose(0, 2, 1, 3).reshape(B, nH, Lq * P)
                g = jnp.take_along_axis(v_l, idx[..., None], axis=2)
                g = g.reshape(B, nH, Lq, P, hd).transpose(0, 2, 1, 3, 4)
                sampled = sampled + g * (wx * wy * valid)[..., None]
        out = out + jnp.sum(
            sampled * attention_weights[:, :, :, lvl, :, None], axis=3)
    return out.reshape(B, Lq, nH * hd)


def ms_deform_attn(p, query, query_pos, reference_points, value, spatial_shapes,
                   key_padding_mask, num_heads, n_levels, n_points):
    B, Lq, D = query.shape
    _, Lv, _ = value.shape
    hd = D // num_heads
    L, P = n_levels, n_points

    v = value_proj_masked(p["value_proj"], value, key_padding_mask)
    v = v.reshape(B, Lv, num_heads, hd)

    sp = posadd_linear(p["sampling_proj"], query, query_pos)   # (B,Lq,nH*L*P*3)
    n_off = num_heads * L * P * 2
    offs = sp[..., :n_off].reshape(B, Lq, num_heads, L, P, 2)
    attw = jax.nn.softmax(
        sp[..., n_off:].reshape(B, Lq, num_heads, L * P), axis=-1
    ).reshape(B, Lq, num_heads, L, P)

    shapes = jnp.asarray(spatial_shapes, jnp.float32)          # (L, 2) = (h, w)
    if reference_points.shape[-1] == 2:
        offset_normalizer = jnp.stack([shapes[:, 1], shapes[:, 0]], -1)
        loc = (reference_points[:, :, None, :, None, :]
               + offs / offset_normalizer[None, None, None, :, None, :])
    else:  # (cx, cy, w, h) reference boxes
        loc = (reference_points[:, :, None, :, None, :2]
               + offs / n_points * reference_points[:, :, None, :, None, 2:] * 0.5)

    return ms_deform_core(v, spatial_shapes, loc, attw)        # (B, Lq, D)


# ----------------------------------------------------------------------------
# Decoder-layer forward (eval mode; dropouts are identity)
# ----------------------------------------------------------------------------
def decoder_layer_forward(params, query, query_pos, reference_points, value,
                          level_start_index, self_attn_mask=None,
                          key_padding_mask=None, *, cfg, spatial_shapes):
    del level_start_index          # implied by the static spatial_shapes
    nH, L, P = cfg["num_heads"], cfg["n_levels"], cfg["n_points"]

    # 1) self-attention: query = norm2(query + MHA(query+pos, query+pos, query))
    query = self_attn_block(params["self_attn"], params["norm2"], query,
                            query_pos, self_attn_mask, nH)

    # 2) deformable cross-attention:
    #    query = norm1(query + output_proj(deform_sample(query+pos, value)))
    sampled = ms_deform_attn(params["cross_attn"], query, query_pos,
                             reference_points, value, spatial_shapes,
                             key_padding_mask, nH, L, P)
    query = proj_residual_norm(sampled, query,
                               params["cross_attn"]["output_proj"],
                               params["norm1"])

    # 3) FFN: query = norm3(query + linear2(relu(linear1(query))))
    return ffn_fused(query, params["linear1"], params["linear2"], params["norm3"])


# ----------------------------------------------------------------------------
# Deterministic parameter initialization (weights stored (in, out) vs torch)
# ----------------------------------------------------------------------------
def init_params(key, cfg):
    D, F = cfg["embed_dim"], cfg["d_ffn"]
    nH, L, P = cfg["num_heads"], cfg["n_levels"], cfg["n_points"]

    def dense(k, fin, fout):
        kw, kb = jax.random.split(k)
        lim = 1.0 / math.sqrt(fin)
        return {"w": jax.random.uniform(kw, (fin, fout), jnp.float32, -lim, lim),
                "b": jax.random.uniform(kb, (fout,), jnp.float32, -lim, lim)}

    def xavier(k, fin, fout):
        lim = math.sqrt(6.0 / (fin + fout))
        return jax.random.uniform(k, (fin, fout), jnp.float32, -lim, lim)

    def norm():
        return {"g": jnp.ones((D,), jnp.float32), "b": jnp.zeros((D,), jnp.float32)}

    ks = jax.random.split(key, 10)
    n_off = nH * L * P * 2
    n_att = nH * L * P
    samp_off = dense(ks[4], D, n_off)
    samp_att = dense(ks[5], D, n_att)
    return {
        "self_attn": {
            "w_qk": jnp.concatenate([xavier(ks[0], D, D), xavier(ks[1], D, D)], 1),
            "b_qk": jnp.zeros((2 * D,), jnp.float32),
            "w_v": xavier(ks[2], D, D),
            "b_v": jnp.zeros((D,), jnp.float32),
            "w_o": xavier(ks[3], D, D),
            "b_o": jnp.zeros((D,), jnp.float32),
        },
        "cross_attn": {
            "value_proj": dense(ks[6], D, D),
            "output_proj": dense(ks[7], D, D),
            # fused [sampling_offsets | attention_weights] projection weights
            "sampling_proj": {
                "w": jnp.concatenate([samp_off["w"], samp_att["w"]], axis=1),
                "b": jnp.concatenate([samp_off["b"], samp_att["b"]], axis=0),
            },
        },
        "norm1": norm(),
        "norm2": norm(),
        "norm3": norm(),
        "linear1": {"w": xavier(ks[8], D, F), "b": jnp.zeros((F,), jnp.float32)},
        "linear2": {"w": xavier(ks[9], F, D), "b": jnp.zeros((D,), jnp.float32)},
    }


# ----------------------------------------------------------------------------
if __name__ == "__main__":
    cfg = dict(embed_dim=128, d_ffn=256, num_heads=4, n_levels=2, n_points=2)
    B, Nq = 2, 16
    spatial_shapes = ((8, 8), (4, 4))
    Lv = sum(h * w for h, w in spatial_shapes)          # 80 value tokens
    D, L = cfg["embed_dim"], cfg["n_levels"]

    key = jax.random.PRNGKey(0)
    kp, kq, kpos, kref, kval = jax.random.split(key, 5)
    params = init_params(kp, cfg)

    query = jax.random.normal(kq, (B, Nq, D), jnp.float32)
    query_pos = jax.random.normal(kpos, (B, Nq, D), jnp.float32)
    # reference boxes (cx, cy, w, h) per level, already in normalized coords
    centers = jax.random.uniform(kref, (B, Nq, L, 2), jnp.float32, 0.2, 0.8)
    sizes = jnp.full((B, Nq, L, 2), 0.2, jnp.float32)
    reference_points = jnp.concatenate([centers, sizes], axis=-1)
    value = jax.random.normal(kval, (B, Lv, D), jnp.float32)

    m0 = np.zeros((B, 8, 8), bool); m0[1, :, 6:] = True
    m1 = np.zeros((B, 4, 4), bool); m1[1, :, 3:] = True
    key_padding_mask = jnp.concatenate(
        [jnp.asarray(m0).reshape(B, -1), jnp.asarray(m1).reshape(B, -1)], axis=1)
    level_start_index = jnp.asarray(
        np.cumsum([0] + [h * w for h, w in spatial_shapes])[:-1], jnp.int32)

    forward = jax.jit(functools.partial(decoder_layer_forward, cfg=cfg,
                                        spatial_shapes=spatial_shapes))
    out = forward(params, query, query_pos, reference_points, value,
                  level_start_index, None, key_padding_mask)
    jax.block_until_ready(out)
    assert out.shape == (B, Nq, D) and out.dtype == jnp.float32
    assert bool(jnp.all(jnp.isfinite(out)))
    print("KERNEL_OK")
</pallas_src>

<mosaic_0001>
module attributes {stable_mosaic.version = 11 : i64} {
  func.func @_posadd_linear_kernel(%arg0: i32, %arg1: memref<32x128xf32, #tpu.memory_space<vmem>>, %arg2: memref<32x128xf32, #tpu.memory_space<vmem>>, %arg3: memref<128x48xf32, #tpu.memory_space<vmem>>, %arg4: memref<1x48xf32, #tpu.memory_space<vmem>>, %arg5: memref<32x48xf32, #tpu.memory_space<vmem>>) attributes {dimension_semantics = [#tpu.dimension_semantics<parallel>], iteration_bounds = array<i64: 1>, scalar_prefetch = 0 : i64, scratch_operands = 0 : i64, tpu.core_type = #tpu.core_type<tc>, window_params = [{transform_indices = @transform_0, window_bounds = array<i64: 32, 128>}, {transform_indices = @transform_1, window_bounds = array<i64: 32, 128>}, {pipeline_mode = #tpu.pipeline_mode<synchronous>, transform_indices = @transform_2, window_bounds = array<i64: 128, 48>}, {pipeline_mode = #tpu.pipeline_mode<synchronous>, transform_indices = @transform_3, window_bounds = array<i64: 1, 48>}, {transform_indices = @transform_4, window_bounds = array<i64: 32, 48>}]} {
    %c0 = arith.constant 0 : index
    %c0_0 = arith.constant 0 : index
    %0 = vector.load %arg1[%c0, %c0_0] : memref<32x128xf32, #tpu.memory_space<vmem>>, vector<32x128xf32>
    %c0_1 = arith.constant 0 : index
    %c0_2 = arith.constant 0 : index
    %1 = vector.load %arg2[%c0_1, %c0_2] : memref<32x128xf32, #tpu.memory_space<vmem>>, vector<32x128xf32>
    %2 = arith.addf %0, %1 : vector<32x128xf32>
    %3 = arith.truncf %2 : vector<32x128xf32> to vector<32x128xbf16>
    %c0_3 = arith.constant 0 : index
    %c0_4 = arith.constant 0 : index
    %4 = vector.load %arg3[%c0_3, %c0_4] : memref<128x48xf32, #tpu.memory_space<vmem>>, vector<128x48xf32>
    %5 = arith.truncf %4 : vector<128x48xf32> to vector<128x48xbf16>
    %cst = arith.constant dense<0.000000e+00> : vector<32x48xf32>
    %6 = tpu.matmul %3, %5, %cst {dimension_numbers = #tpu.dot_dimension_numbers<[1], [0], [0], [1], [0, 0, 1, 1], [], []>} : vector<32x128xbf16>, vector<128x48xbf16>, vector<32x48xf32> -> vector<32x48xf32>
    %c0_5 = arith.constant 0 : index
    %c0_6 = arith.constant 0 : index
    %7 = vector.load %arg4[%c0_5, %c0_6] : memref<1x48xf32, #tpu.memory_space<vmem>>, vector<1x48xf32>
    %8 = vector.broadcast %7 : vector<1x48xf32> to vector<32x48xf32>
    %9 = arith.addf %6, %8 : vector<32x48xf32>
    %c0_7 = arith.constant 0 : index
    %c0_8 = arith.constant 0 : index
    %10 = vector.load %arg5[%c0_7, %c0_8] : memref<32x48xf32, #tpu.memory_space<vmem>>, vector<32x48xf32>
    tpu.vector_store %arg5[%c0_7, %c0_8], %9 {strides = array<i32>} : memref<32x48xf32, #tpu.memory_space<vmem>>, vector<32x48xf32>,
    return
  }
  func.func @transform_0(%arg0: i32) -> (i32, i32) {
    %c0_i32 = arith.constant 0 : i32
    %c0_i32_0 = arith.constant 0 : i32
    return %arg0, %c0_i32 : i32, i32
  }
  func.func @transform_1(%arg0: i32) -> (i32, i32) {
    %c0_i32 = arith.constant 0 : i32
    %c0_i32_0 = arith.constant 0 : i32
    return %arg0, %c0_i32 : i32, i32
  }
  func.func @transform_2(%arg0: i32) -> (i32, i32) {
    %c0_i32 = arith.constant 0 : i32
    %c0_i32_0 = arith.constant 0 : i32
    %c0_i32_1 = arith.constant 0 : i32
    return %c0_i32, %c0_i32_0 : i32, i32
  }
  func.func @transform_3(%arg0: i32) -> (i32, i32) {
    %c0_i32 = arith.constant 0 : i32
    %c0_i32_0 = arith.constant 0 : i32
    %c0_i32_1 = arith.constant 0 : i32
    return %c0_i32, %c0_i32_0 : i32, i32
  }
  func.func @transform_4(%arg0: i32) -> (i32, i32) {
    %c0_i32 = arith.constant 0 : i32
    %c0_i32_0 = arith.constant 0 : i32
    return %arg0, %c0_i32 : i32, i32
  }
}

module attributes {stable_mosaic.version = 11 : i64} {
  func.func @_self_attn_block_kernel(%arg0: i32, %arg1: memref<1x16x128xf32, #tpu.memory_space<vmem>>, %arg2: memref<1x16x128xf32, #tpu.memory_space<vmem>>, %arg3: memref<16x16xf32, #tpu.memory_space<vmem>>, %arg4: memref<128x256xf32, #tpu.memory_space<vmem>>, %arg5: memref<1x256xf32, #tpu.memory_space<vmem>>, %arg6: memref<128x128xf32, #tpu.memory_space<vmem>>, %arg7: memref<1x128xf32, #tpu.memory_space<vmem>>, %arg8: memref<128x128xf32, #tpu.memory_space<vmem>>, %arg9: memref<1x128xf32, #tpu.memory_space<vmem>>, %arg10: memref<1x128xf32, #tpu.memory_space<vmem>>, %arg11: memref<1x128xf32, #tpu.memory_space<vmem>>, %arg12: memref<1x16x128xf32, #tpu.memory_space<vmem>>) attributes {dimension_semantics = [#tpu.dimension_semantics<parallel>], iteration_bounds = array<i64: 2>, scalar_prefetch = 0 : i64, scratch_operands = 0 : i64, tpu.core_type = #tpu.core_type<tc>, window_params = [{transform_indices = @transform_0, window_bounds = array<i64: 1, 16, 128>}, {transform_indices = @transform_1, window_bounds = array<i64: 1, 16, 128>}, {pipeline_mode = #tpu.pipeline_mode<synchronous>, transform_indices = @transform_2, window_bounds = array<i64: 16, 16>}, {pipeline_mode = #tpu.pipeline_mode<synchronous>, transform_indices = @transform_3, window_bounds = array<i64: 128, 256>}, {pipeline_mode = #tpu.pipeline_mode<synchronous>, transform_indices = @transform_4, window_bounds = array<i64: 1, 256>}, {pipeline_mode = #tpu.pipeline_mode<synchronous>, transform_indices = @transform_5, window_bounds = array<i64: 128, 128>}, {pipeline_mode = #tpu.pipeline_mode<synchronous>, transform_indices = @transform_6, window_bounds = array<i64: 1, 128>}, {pipeline_mode = #tpu.pipeline_mode<synchronous>, transform_indices = @transform_7, window_bounds = array<i64: 128, 128>}, {pipeline_mode = #tpu.pipeline_mode<synchronous>, transform_indices = @transform_8, window_bounds = array<i64: 1, 128>}, {pipeline_mode = #tpu.pipeline_mode<synchronous>, transform_indices = @transform_9, window_bounds = array<i64: 1, 128>}, {pipeline_mode = #tpu.pipeline_mode<synchronous>, transform_indices = @transform_10, window_bounds = array<i64: 1, 128>}, {transform_indices = @transform_11, window_bounds = array<i64: 1, 16, 128>}]} {
    %c0 = arith.constant 0 : index
    %c0_0 = arith.constant 0 : index
    %c0_1 = arith.constant 0 : index
    %0 = vector.load %arg1[%c0, %c0_0, %c0_1] : memref<1x16x128xf32, #tpu.memory_space<vmem>>, vector<1x16x128xf32>
    %1 = vector.shape_cast %0 : vector<1x16x128xf32> to vector<16x128xf32>
    %c0_2 = arith.constant 0 : index
    %c0_3 = arith.constant 0 : index
    %c0_4 = arith.constant 0 : index
    %2 = vector.load %arg2[%c0_2, %c0_3, %c0_4] : memref<1x16x128xf32, #tpu.memory_space<vmem>>, vector<1x16x128xf32>
    %3 = vector.shape_cast %2 : vector<1x16x128xf32> to vector<16x128xf32>
    %4 = arith.addf %1, %3 : vector<16x128xf32>
    %5 = arith.truncf %4 : vector<16x128xf32> to vector<16x128xbf16>
    %c0_5 = arith.constant 0 : index
    %c0_6 = arith.constant 0 : index
    %6 = vector.load %arg4[%c0_5, %c0_6] : memref<128x256xf32, #tpu.memory_space<vmem>>, vector<128x256xf32>
    %7 = arith.truncf %6 : vector<128x256xf32> to vector<128x256xbf16>
    %cst = arith.constant dense<0.000000e+00> : vector<16x256xf32>
    %8 = tpu.matmul %5, %7, %cst {dimension_numbers = #tpu.dot_dimension_numbers<[1], [0], [0], [1], [0, 0, 1, 1], [], []>} : vector<16x128xbf16>, vector<128x256xbf16>, vector<16x256xf32> -> vector<16x256xf32>
    %c0_7 = arith.constant 0 : index
    %c0_8 = arith.constant 0 : index
    %9 = vector.load %arg5[%c0_7, %c0_8] : memref<1x256xf32, #tpu.memory_space<vmem>>, vector<1x256xf32>
    %10 = vector.broadcast %9 : vector<1x256xf32> to vector<16x256xf32>
    %11 = arith.addf %8, %10 : vector<16x256xf32>
    %12 = arith.truncf %1 : vector<16x128xf32> to vector<16x128xbf16>
    %c0_9 = arith.constant 0 : index
    %c0_10 = arith.constant 0 : index
    %13 = vector.load %arg6[%c0_9, %c0_10] : memref<128x128xf32, #tpu.memory_space<vmem>>, vector<128x128xf32>
    %14 = arith.truncf %13 : vector<128x128xf32> to vector<128x128xbf16>
    %cst_11 = arith.constant dense<0.000000e+00> : vector<16x128xf32>
    %15 = tpu.matmul %12, %14, %cst_11 {dimension_numbers = #tpu.dot_dimension_numbers<[1], [0], [0], [1], [0, 0, 1, 1], [], []>} : vector<16x128xbf16>, vector<128x128xbf16>, vector<16x128xf32> -> vector<16x128xf32>
    %c0_12 = arith.constant 0 : index
    %c0_13 = arith.constant 0 : index
    %16 = vector.load %arg7[%c0_12, %c0_13] : memref<1x128xf32, #tpu.memory_space<vmem>>, vector<1x128xf32>
    %17 = vector.broadcast %16 : vector<1x128xf32> to vector<16x128xf32>
    %18 = arith.addf %15, %17 : vector<16x128xf32>
    %19 = vector.extract_strided_slice %11 {offsets = [0, 0], sizes = [16, 128], strides = [1, 1]} : vector<16x256xf32> to vector<16x128xf32>
    %20 = vector.extract_strided_slice %11 {offsets = [0, 128], sizes = [16, 128], strides = [1, 1]} : vector<16x256xf32> to vector<16x128xf32>
    %c0_14 = arith.constant 0 : index
    %c0_15 = arith.constant 0 : index
    %21 = vector.load %arg3[%c0_14, %c0_15] : memref<16x16xf32, #tpu.memory_space<vmem>>, vector<16x16xf32>
    %22 = vector.extract_strided_slice %19 {offsets = [0, 0], sizes = [16, 32], strides = [1, 1]} : vector<16x128xf32> to vector<16x32xf32>
    %23 = vector.extract_strided_slice %20 {offsets = [0, 0], sizes = [16, 32], strides = [1, 1]} : vector<16x128xf32> to vector<16x32xf32>
    %24 = vector.extract_strided_slice %18 {offsets = [0, 0], sizes = [16, 32], strides = [1, 1]} : vector<16x128xf32> to vector<16x32xf32>
    %25 = arith.truncf %22 : vector<16x32xf32> to vector<16x32xbf16>
    %26 = arith.truncf %23 : vector<16x32xf32> to vector<16x32xbf16>
    %cst_16 = arith.constant dense<0.000000e+00> : vector<16x16xf32>
    %27 = tpu.matmul %25, %26, %cst_16 {dimension_numbers = #tpu.dot_dimension_numbers<[1], [1], [0], [0], [0, 0, 1, 0], [], []>} : vector<16x32xbf16>, vector<16x32xbf16>, vector<16x16xf32> -> vector<16x16xf32>
    %cst_17 = arith.constant 0.176776692 : f32
    %28 = vector.broadcast %cst_17 : f32 to vector<16x16xf32>
    %29 = arith.mulf %27, %28 : vector<16x16xf32>
    %30 = arith.addf %29, %21 : vector<16x16xf32>
    %cst_18 = arith.constant dense<0xFF800000> : vector<16xf32>
    %31 = vector.multi_reduction <maximumf>, %30, %cst_18 [1] : vector<16x16xf32> to vector<16xf32>
    %32 = vector.shape_cast %31 : vector<16xf32> to vector<16x1xf32>
    %33 = vector.broadcast %32 : vector<16x1xf32> to vector<16x16xf32>
    %34 = arith.subf %30, %33 : vector<16x16xf32>
    %35 = math.exp %34 : vector<16x16xf32>
    %cst_19 = arith.constant dense<0.000000e+00> : vector<16xf32>
    %36 = vector.multi_reduction <add>, %35, %cst_19 [1] : vector<16x16xf32> to vector<16xf32>
    %37 = vector.shape_cast %36 : vector<16xf32> to vector<16x1xf32>
    %38 = tpu.reciprocal %37 {approx = true} : vector<16x1xf32> -> vector<16x1xf32>
    %39 = vector.broadcast %38 : vector<16x1xf32> to vector<16x16xf32>
    %40 = arith.mulf %35, %39 : vector<16x16xf32>
    %41 = arith.truncf %40 : vector<16x16xf32> to vector<16x16xbf16>
    %42 = arith.truncf %24 : vector<16x32xf32> to vector<16x32xbf16>
    %cst_20 = arith.constant dense<0.000000e+00> : vector<16x32xf32>
    %43 = tpu.matmul %41, %42, %cst_20 {dimension_numbers = #tpu.dot_dimension_numbers<[1], [0], [0], [1], [0, 0, 1, 1], [], []>} : vector<16x16xbf16>, vector<16x32xbf16>, vector<16x32xf32> -> vector<16x32xf32>
    %44 = vector.extract_strided_slice %19 {offsets = [0, 32], sizes = [16, 32], strides = [1, 1]} : vector<16x128xf32> to vector<16x32xf32>
    %45 = vector.extract_strided_slice %20 {offsets = [0, 32], sizes = [16, 32], strides = [1, 1]} : vector<16x128xf32> to vector<16x32xf32>
    %46 = vector.extract_strided_slice %18 {offsets = [0, 32], sizes = [16, 32], strides = [1, 1]} : vector<16x128xf32> to vector<16x32xf32>
    %47 = arith.truncf %44 : vector<16x32xf32> to vector<16x32xbf16>
    %48 = arith.truncf %45 : vector<16x32xf32> to vector<16x32xbf16>
    %cst_21 = arith.constant dense<0.000000e+00> : vector<16x16xf32>
    %49 = tpu.matmul %47, %48, %cst_21 {dimension_numbers = #tpu.dot_dimension_numbers<[1], [1], [0], [0], [0, 0, 1, 0], [], []>} : vector<16x32xbf16>, vector<16x32xbf16>, vector<16x16xf32> -> vector<16x16xf32>
    %cst_22 = arith.constant 0.176776692 : f32
    %50 = vector.broadcast %cst_22 : f32 to vector<16x16xf32>
    %51 = arith.mulf %49, %50 : vector<16x16xf32>
    %52 = arith.addf %51, %21 : vector<16x16xf32>
    %cst_23 = arith.constant dense<0xFF800000> : vector<16xf32>
    %53 = vector.multi_reduction <maximumf>, %52, %cst_23 [1] : vector<16x16xf32> to vector<16xf32>
    %54 = vector.shape_cast %53 : vector<16xf32> to vector<16x1xf32>
    %55 = vector.broadcast %54 : vector<16x1xf32> to vector<16x16xf32>
    %56 = arith.subf %52, %55 : vector<16x16xf32>
    %57 = math.exp %56 : vector<16x16xf32>
    %cst_24 = arith.constant dense<0.000000e+00> : vector<16xf32>
    %58 = vector.multi_reduction <add>, %57, %cst_24 [1] : vector<16x16xf32> to vector<16xf32>
    %59 = vector.shape_cast %58 : vector<16xf32> to vector<16x1xf32>
    %60 = tpu.reciprocal %59 {approx = true} : vector<16x1xf32> -> vector<16x1xf32>
    %61 = vector.broadcast %60 : vector<16x1xf32> to vector<16x16xf32>
    %62 = arith.mulf %57, %61 : vector<16x16xf32>
    %63 = arith.truncf %62 : vector<16x16xf32> to vector<16x16xbf16>
    %64 = arith.truncf %46 : vector<16x32xf32> to vector<16x32xbf16>
    %cst_25 = arith.constant dense<0.000000e+00> : vector<16x32xf32>
    %65 = tpu.matmul %63, %64, %cst_25 {dimension_numbers = #tpu.dot_dimension_numbers<[1], [0], [0], [1], [0, 0, 1, 1], [], []>} : vector<16x16xbf16>, vector<16x32xbf16>, vector<16x32xf32> -> vector<16x32xf32>
    %66 = vector.extract_strided_slice %19 {offsets = [0, 64], sizes = [16, 32], strides = [1, 1]} : vector<16x128xf32> to vector<16x32xf32>
    %67 = vector.extract_strided_slice %20 {offsets = [0, 64], sizes = [16, 32], strides = [1, 1]} : vector<16x128xf32> to vector<16x32xf32>
    %68 = vector.extract_strided_slice %18 {offsets = [0, 64], sizes = [16, 32], strides = [1, 1]} : vector<16x128xf32> to vector<16x32xf32>
    %69 = arith.truncf %66 : vector<16x32xf32> to vector<16x32xbf16>
    %70 = arith.truncf %67 : vector<16x32xf32> to vector<16x32xbf16>
    %cst_26 = arith.constant dense<0.000000e+00> : vector<16x16xf32>
    %71 = tpu.matmul %69, %70, %cst_26 {dimension_numbers = #tpu.dot_dimension_numbers<[1], [1], [0], [0], [0, 0, 1, 0], [], []>} : vector<16x32xbf16>, vector<16x32xbf16>, vector<16x16xf32> -> vector<16x16xf32>
    %cst_27 = arith.constant 0.176776692 : f32
    %72 = vector.broadcast %cst_27 : f32 to vector<16x16xf32>
    %73 = arith.mulf %71, %72 : vector<16x16xf32>
    %74 = arith.addf %73, %21 : vector<16x16xf32>
    %cst_28 = arith.constant dense<0xFF800000> : vector<16xf32>
    %75 = vector.multi_reduction <maximumf>, %74, %cst_28 [1] : vector<16x16xf32> to vector<16xf32>
    %76 = vector.shape_cast %75 : vector<16xf32> to vector<16x1xf32>
    %77 = vector.broadcast %76 : vector<16x1xf32> to vector<16x16xf32>
    %78 = arith.subf %74, %77 : vector<16x16xf32>
    %79 = math.exp %78 : vector<16x16xf32>
    %cst_29 = arith.constant dense<0.000000e+00> : vector<16xf32>
    %80 = vector.multi_reduction <add>, %79, %cst_29 [1] : vector<16x16xf32> to vector<16xf32>
    %81 = vector.shape_cast %80 : vector<16xf32> to vector<16x1xf32>
    %82 = tpu.reciprocal %81 {approx = true} : vector<16x1xf32> -> vector<16x1xf32>
    %83 = vector.broadcast %82 : vector<16x1xf32> to vector<16x16xf32>
    %84 = arith.mulf %79, %83 : vector<16x16xf32>
    %85 = arith.truncf %84 : vector<16x16xf32> to vector<16x16xbf16>
    %86 = arith.truncf %68 : vector<16x32xf32> to vector<16x32xbf16>
    %cst_30 = arith.constant dense<0.000000e+00> : vector<16x32xf32>
    %87 = tpu.matmul %85, %86, %cst_30 {dimension_numbers = #tpu.dot_dimension_numbers<[1], [0], [0], [1], [0, 0, 1, 1], [], []>} : vector<16x16xbf16>, vector<16x32xbf16>, vector<16x32xf32> -> vector<16x32xf32>
    %88 = vector.extract_strided_slice %19 {offsets = [0, 96], sizes = [16, 32], strides = [1, 1]} : vector<16x128xf32> to vector<16x32xf32>
    %89 = vector.extract_strided_slice %20 {offsets = [0, 96], sizes = [16, 32], strides = [1, 1]} : vector<16x128xf32> to vector<16x32xf32>
    %90 = vector.extract_strided_slice %18 {offsets = [0, 96], sizes = [16, 32], strides = [1, 1]} : vector<16x128xf32> to vector<16x32xf32>
    %91 = arith.truncf %88 : vector<16x32xf32> to vector<16x32xbf16>
    %92 = arith.truncf %89 : vector<16x32xf32> to vector<16x32xbf16>
    %cst_31 = arith.constant dense<0.000000e+00> : vector<16x16xf32>
    %93 = tpu.matmul %91, %92, %cst_31 {dimension_numbers = #tpu.dot_dimension_numbers<[1], [1], [0], [0], [0, 0, 1, 0], [], []>} : vector<16x32xbf16>, vector<16x32xbf16>, vector<16x16xf32> -> vector<16x16xf32>
    %cst_32 = arith.constant 0.176776692 : f32
    %94 = vector.broadcast %cst_32 : f32 to vector<16x16xf32>
    %95 = arith.mulf %93, %94 : vector<16x16xf32>
    %96 = arith.addf %95, %21 : vector<16x16xf32>
    %cst_33 = arith.constant dense<0xFF800000> : vector<16xf32>
    %97 = vector.multi_reduction <maximumf>, %96, %cst_33 [1] : vector<16x16xf32> to vector<16xf32>
    %98 = vector.shape_cast %97 : vector<16xf32> to vector<16x1xf32>
    %99 = vector.broadcast %98 : vector<16x1xf32> to vector<16x16xf32>
    %100 = arith.subf %96, %99 : vector<16x16xf32>
    %101 = math.exp %100 : vector<16x16xf32>
    %cst_34 = arith.constant dense<0.000000e+00> : vector<16xf32>
    %102 = vector.multi_reduction <add>, %101, %cst_34 [1] : vector<16x16xf32> to vector<16xf32>
    %103 = vector.shape_cast %102 : vector<16xf32> to vector<16x1xf32>
    %104 = tpu.reciprocal %103 {approx = true} : vector<16x1xf32> -> vector<16x1xf32>
    %105 = vector.broadcast %104 : vector<16x1xf32> to vector<16x16xf32>
    %106 = arith.mulf %101, %105 : vector<16x16xf32>
    %107 = arith.truncf %106 : vector<16x16xf32> to vector<16x16xbf16>
    %108 = arith.truncf %90 : vector<16x32xf32> to vector<16x32xbf16>
    %cst_35 = arith.constant dense<0.000000e+00> : vector<16x32xf32>
    %109 = tpu.matmul %107, %108, %cst_35 {dimension_numbers = #tpu.dot_dimension_numbers<[1], [0], [0], [1], [0, 0, 1, 1], [], []>} : vector<16x16xbf16>, vector<16x32xbf16>, vector<16x32xf32> -> vector<16x32xf32>
    %110 = tpu.concatenate %43, %65, %87, %109 in 1 : vector<16x32xf32>, vector<16x32xf32>, vector<16x32xf32>, vector<16x32xf32> -> vector<16x128xf32>
    %111 = arith.truncf %110 : vector<16x128xf32> to vector<16x128xbf16>
    %c0_36 = arith.constant 0 : index
    %c0_37 = arith.constant 0 : index
    %112 = vector.load %arg8[%c0_36, %c0_37] : memref<128x128xf32, #tpu.memory_space<vmem>>, vector<128x128xf32>
    %113 = arith.truncf %112 : vector<128x128xf32> to vector<128x128xbf16>
    %cst_38 = arith.constant dense<0.000000e+00> : vector<16x128xf32>
    %114 = tpu.matmul %111, %113, %cst_38 {dimension_numbers = #tpu.dot_dimension_numbers<[1], [0], [0], [1], [0, 0, 1, 1], [], []>} : vector<16x128xbf16>, vector<128x128xbf16>, vector<16x128xf32> -> vector<16x128xf32>
    %c0_39 = arith.constant 0 : index
    %c0_40 = arith.constant 0 : index
    %115 = vector.load %arg9[%c0_39, %c0_40] : memref<1x128xf32, #tpu.memory_space<vmem>>, vector<1x128xf32>
    %116 = vector.broadcast %115 : vector<1x128xf32> to vector<16x128xf32>
    %117 = arith.addf %114, %116 : vector<16x128xf32>
    %118 = arith.addf %1, %117 : vector<16x128xf32>
    %c0_41 = arith.constant 0 : index
    %c0_42 = arith.constant 0 : index
    %119 = vector.load %arg10[%c0_41, %c0_42] : memref<1x128xf32, #tpu.memory_space<vmem>>, vector<1x128xf32>
    %c0_43 = arith.constant 0 : index
    %c0_44 = arith.constant 0 : index
    %120 = vector.load %arg11[%c0_43, %c0_44] : memref<1x128xf32, #tpu.memory_space<vmem>>, vector<1x128xf32>
    %cst_45 = arith.constant dense<0.000000e+00> : vector<16xf32>
    %121 = vector.multi_reduction <add>, %118, %cst_45 [1] : vector<16x128xf32> to vector<16xf32>
    %122 = vector.shape_cast %121 : vector<16xf32> to vector<16x1xf32>
    %cst_46 = arith.constant 1.280000e+02 : f32
    %123 = vector.broadcast %cst_46 : f32 to vector<16x1xf32>
    %124 = arith.divf %122, %123 : vector<16x1xf32>
    %125 = vector.broadcast %124 : vector<16x1xf32> to vector<16x128xf32>
    %126 = arith.subf %118, %125 : vector<16x128xf32>
    %127 = arith.mulf %126, %126 : vector<16x128xf32>
    %cst_47 = arith.constant dense<0.000000e+00> : vector<16xf32>
    %128 = vector.multi_reduction <add>, %127, %cst_47 [1] : vector<16x128xf32> to vector<16xf32>
    %129 = vector.shape_cast %128 : vector<16xf32> to vector<16x1xf32>
    %cst_48 = arith.constant 1.280000e+02 : f32
    %130 = vector.broadcast %cst_48 : f32 to vector<16x1xf32>
    %131 = arith.divf %129, %130 : vector<16x1xf32>
    %132 = vector.broadcast %124 : vector<16x1xf32> to vector<16x128xf32>
    %133 = arith.subf %118, %132 : vector<16x128xf32>
    %cst_49 = arith.constant 9.99999974E-6 : f32
    %134 = vector.broadcast %cst_49 : f32 to vector<16x1xf32>
    %135 = arith.addf %131, %134 : vector<16x1xf32>
    %136 = math.rsqrt %135 : vector<16x1xf32>
    %137 = vector.broadcast %136 : vector<16x1xf32> to vector<16x128xf32>
    %138 = arith.mulf %133, %137 : vector<16x128xf32>
    %139 = vector.broadcast %119 : vector<1x128xf32> to vector<16x128xf32>
    %140 = arith.mulf %138, %139 : vector<16x128xf32>
    %141 = vector.broadcast %120 : vector<1x128xf32> to vector<16x128xf32>
    %142 = arith.addf %140, %141 : vector<16x128xf32>
    %c0_50 = arith.constant 0 : index
    %c0_51 = arith.constant 0 : index
    %c0_52 = arith.constant 0 : index
    %143 = vector.load %arg12[%c0_50, %c0_51, %c0_52] : memref<1x16x128xf32, #tpu.memory_space<vmem>>, vector<1x16x128xf32>
    %144 = vector.shape_cast %143 : vector<1x16x128xf32> to vector<16x128xf32>
    %145 = vector.shape_cast %142 : vector<16x128xf32> to vector<1x16x128xf32>
    tpu.vector_store %arg12[%c0_50, %c0_51, %c0_52], %145 {strides = array<i32>} : memref<1x16x128xf32, #tpu.memory_space<vmem>>, vector<1x16x128xf32>,
    return
  }
  func.func @transform_0(%arg0: i32) -> (i32, i32, i32) {
    %c0_i32 = arith.constant 0 : i32
    %c0_i32_0 = arith.constant 0 : i32
    %c0_i32_1 = arith.constant 0 : i32
    return %arg0, %c0_i32, %c0_i32_0 : i32, i32, i32
  }
  func.func @transform_1(%arg0: i32) -> (i32, i32, i32) {
    %c0_i32 = arith.constant 0 : i32
    %c0_i32_0 = arith.constant 0 : i32
    %c0_i32_1 = arith.constant 0 : i32
    return %arg0, %c0_i32, %c0_i32_0 : i32, i32, i32
  }
  func.func @transform_2(%arg0: i32) -> (i32, i32) {
    %c0_i32 = arith.constant 0 : i32
    %c0_i32_0 = arith.constant 0 : i32
    %c0_i32_1 = arith.constant 0 : i32
    return %c0_i32, %c0_i32_0 : i32, i32
  }
  func.func @transform_3(%arg0: i32) -> (i32, i32) {
    %c0_i32 = arith.constant 0 : i32
    %c0_i32_0 = arith.constant 0 : i32
    %c0_i32_1 = arith.constant 0 : i32
    return %c0_i32, %c0_i32_0 : i32, i32
  }
  func.func @transform_4(%arg0: i32) -> (i32, i32) {
    %c0_i32 = arith.constant 0 : i32
    %c0_i32_0 = arith.constant 0 : i32
    %c0_i32_1 = arith.constant 0 : i32
    return %c0_i32, %c0_i32_0 : i32, i32
  }
  func.func @transform_5(%arg0: i32) -> (i32, i32) {
    %c0_i32 = arith.constant 0 : i32
    %c0_i32_0 = arith.constant 0 : i32
    %c0_i32_1 = arith.constant 0 : i32
    return %c0_i32, %c0_i32_0 : i32, i32
  }
  func.func @transform_6(%arg0: i32) -> (i32, i32) {
    %c0_i32 = arith.constant 0 : i32
    %c0_i32_0 = arith.constant 0 : i32
    %c0_i32_1 = arith.constant 0 : i32
    return %c0_i32, %c0_i32_0 : i32, i32
  }
  func.func @transform_7(%arg0: i32) -> (i32, i32) {
    %c0_i32 = arith.constant 0 : i32
    %c0_i32_0 = arith.constant 0 : i32
    %c0_i32_1 = arith.constant 0 : i32
    return %c0_i32, %c0_i32_0 : i32, i32
  }
  func.func @transform_8(%arg0: i32) -> (i32, i32) {
    %c0_i32 = arith.constant 0 : i32
    %c0_i32_0 = arith.constant 0 : i32
    %c0_i32_1 = arith.constant 0 : i32
    return %c0_i32, %c0_i32_0 : i32, i32
  }
  func.func @transform_9(%arg0: i32) -> (i32, i32) {
    %c0_i32 = arith.constant 0 : i32
    %c0_i32_0 = arith.constant 0 : i32
    %c0_i32_1 = arith.constant 0 : i32
    return %c0_i32, %c0_i32_0 : i32, i32
  }
  func.func @transform_10(%arg0: i32) -> (i32, i32) {
    %c0_i32 = arith.constant 0 : i32
    %c0_i32_0 = arith.constant 0 : i32
    %c0_i32_1 = arith.constant 0 : i32
    return %c0_i32, %c0_i32_0 : i32, i32
  }
  func.func @transform_11(%arg0: i32) -> (i32, i32, i32) {
    %c0_i32 = arith.constant 0 : i32
    %c0_i32_0 = arith.constant 0 : i32
    %c0_i32_1 = arith.constant 0 : i32
    return %arg0, %c0_i32, %c0_i32_0 : i32, i32, i32
  }
}

module attributes {stable_mosaic.version = 11 : i64} {
  func.func @_value_proj_kernel(%arg0: i32, %arg1: memref<160x128xf32, #tpu.memory_space<vmem>>, %arg2: memref<160x1xf32, #tpu.memory_space<vmem>>, %arg3: memref<128x128xf32, #tpu.memory_space<vmem>>, %arg4: memref<1x128xf32, #tpu.memory_space<vmem>>, %arg5: memref<160x128xf32, #tpu.memory_space<vmem>>) attributes {dimension_semantics = [#tpu.dimension_semantics<parallel>], iteration_bounds = array<i64: 1>, scalar_prefetch = 0 : i64, scratch_operands = 0 : i64, tpu.core_type = #tpu.core_type<tc>, window_params = [{transform_indices = @transform_0, window_bounds = array<i64: 160, 128>}, {transform_indices = @transform_1, window_bounds = array<i64: 160, 1>}, {pipeline_mode = #tpu.pipeline_mode<synchronous>, transform_indices = @transform_2, window_bounds = array<i64: 128, 128>}, {pipeline_mode = #tpu.pipeline_mode<synchronous>, transform_indices = @transform_3, window_bounds = array<i64: 1, 128>}, {transform_indices = @transform_4, window_bounds = array<i64: 160, 128>}]} {
    %c0 = arith.constant 0 : index
    %c0_0 = arith.constant 0 : index
    %0 = vector.load %arg1[%c0, %c0_0] : memref<160x128xf32, #tpu.memory_space<vmem>>, vector<160x128xf32>
    %1 = arith.truncf %0 : vector<160x128xf32> to vector<160x128xbf16>
    %c0_1 = arith.constant 0 : index
    %c0_2 = arith.constant 0 : index
    %2 = vector.load %arg3[%c0_1, %c0_2] : memref<128x128xf32, #tpu.memory_space<vmem>>, vector<128x128xf32>
    %3 = arith.truncf %2 : vector<128x128xf32> to vector<128x128xbf16>
    %cst = arith.constant dense<0.000000e+00> : vector<160x128xf32>
    %4 = tpu.matmul %1, %3, %cst {dimension_numbers = #tpu.dot_dimension_numbers<[1], [0], [0], [1], [0, 0, 1, 1], [], []>} : vector<160x128xbf16>, vector<128x128xbf16>, vector<160x128xf32> -> vector<160x128xf32>
    %c0_3 = arith.constant 0 : index
    %c0_4 = arith.constant 0 : index
    %5 = vector.load %arg4[%c0_3, %c0_4] : memref<1x128xf32, #tpu.memory_space<vmem>>, vector<1x128xf32>
    %6 = vector.broadcast %5 : vector<1x128xf32> to vector<160x128xf32>
    %7 = arith.addf %4, %6 : vector<160x128xf32>
    %c0_5 = arith.constant 0 : index
    %c0_6 = arith.constant 0 : index
    %8 = vector.load %arg2[%c0_5, %c0_6] : memref<160x1xf32, #tpu.memory_space<vmem>>, vector<160x1xf32>
    %9 = vector.broadcast %8 : vector<160x1xf32> to vector<160x128xf32>
    %10 = arith.mulf %7, %9 : vector<160x128xf32>
    %c0_7 = arith.constant 0 : index
    %c0_8 = arith.constant 0 : index
    %11 = vector.load %arg5[%c0_7, %c0_8] : memref<160x128xf32, #tpu.memory_space<vmem>>, vector<160x128xf32>
    tpu.vector_store %arg5[%c0_7, %c0_8], %10 {strides = array<i32>} : memref<160x128xf32, #tpu.memory_space<vmem>>, vector<160x128xf32>,
    return
  }
  func.func @transform_0(%arg0: i32) -> (i32, i32) {
    %c0_i32 = arith.constant 0 : i32
    %c0_i32_0 = arith.constant 0 : i32
    return %arg0, %c0_i32 : i32, i32
  }
  func.func @transform_1(%arg0: i32) -> (i32, i32) {
    %c0_i32 = arith.constant 0 : i32
    %c0_i32_0 = arith.constant 0 : i32
    return %arg0, %c0_i32 : i32, i32
  }
  func.func @transform_2(%arg0: i32) -> (i32, i32) {
    %c0_i32 = arith.constant 0 : i32
    %c0_i32_0 = arith.constant 0 : i32
    %c0_i32_1 = arith.constant 0 : i32
    return %c0_i32, %c0_i32_0 : i32, i32
  }
  func.func @transform_3(%arg0: i32) -> (i32, i32) {
    %c0_i32 = arith.constant 0 : i32
    %c0_i32_0 = arith.constant 0 : i32
    %c0_i32_1 = arith.constant 0 : i32
    return %c0_i32, %c0_i32_0 : i32, i32
  }
  func.func @transform_4(%arg0: i32) -> (i32, i32) {
    %c0_i32 = arith.constant 0 : i32
    %c0_i32_0 = arith.constant 0 : i32
    return %arg0, %c0_i32 : i32, i32
  }
}

module attributes {stable_mosaic.version = 11 : i64} {
  func.func @_proj_residual_norm_kernel(%arg0: i32, %arg1: memref<32x128xf32, #tpu.memory_space<vmem>>, %arg2: memref<32x128xf32, #tpu.memory_space<vmem>>, %arg3: memref<128x128xf32, #tpu.memory_space<vmem>>, %arg4: memref<1x128xf32, #tpu.memory_space<vmem>>, %arg5: memref<1x128xf32, #tpu.memory_space<vmem>>, %arg6: memref<1x128xf32, #tpu.memory_space<vmem>>, %arg7: memref<32x128xf32, #tpu.memory_space<vmem>>) attributes {dimension_semantics = [#tpu.dimension_semantics<parallel>], iteration_bounds = array<i64: 1>, scalar_prefetch = 0 : i64, scratch_operands = 0 : i64, tpu.core_type = #tpu.core_type<tc>, window_params = [{transform_indices = @transform_0, window_bounds = array<i64: 32, 128>}, {transform_indices = @transform_1, window_bounds = array<i64: 32, 128>}, {pipeline_mode = #tpu.pipeline_mode<synchronous>, transform_indices = @transform_2, window_bounds = array<i64: 128, 128>}, {pipeline_mode = #tpu.pipeline_mode<synchronous>, transform_indices = @transform_3, window_bounds = array<i64: 1, 128>}, {pipeline_mode = #tpu.pipeline_mode<synchronous>, transform_indices = @transform_4, window_bounds = array<i64: 1, 128>}, {pipeline_mode = #tpu.pipeline_mode<synchronous>, transform_indices = @transform_5, window_bounds = array<i64: 1, 128>}, {transform_indices = @transform_6, window_bounds = array<i64: 32, 128>}]} {
    %c0 = arith.constant 0 : index
    %c0_0 = arith.constant 0 : index
    %0 = vector.load %arg1[%c0, %c0_0] : memref<32x128xf32, #tpu.memory_space<vmem>>, vector<32x128xf32>
    %1 = arith.truncf %0 : vector<32x128xf32> to vector<32x128xbf16>
    %c0_1 = arith.constant 0 : index
    %c0_2 = arith.constant 0 : index
    %2 = vector.load %arg3[%c0_1, %c0_2] : memref<128x128xf32, #tpu.memory_space<vmem>>, vector<128x128xf32>
    %3 = arith.truncf %2 : vector<128x128xf32> to vector<128x128xbf16>
    %cst = arith.constant dense<0.000000e+00> : vector<32x128xf32>
    %4 = tpu.matmul %1, %3, %cst {dimension_numbers = #tpu.dot_dimension_numbers<[1], [0], [0], [1], [0, 0, 1, 1], [], []>} : vector<32x128xbf16>, vector<128x128xbf16>, vector<32x128xf32> -> vector<32x128xf32>
    %c0_3 = arith.constant 0 : index
    %c0_4 = arith.constant 0 : index
    %5 = vector.load %arg4[%c0_3, %c0_4] : memref<1x128xf32, #tpu.memory_space<vmem>>, vector<1x128xf32>
    %6 = vector.broadcast %5 : vector<1x128xf32> to vector<32x128xf32>
    %7 = arith.addf %4, %6 : vector<32x128xf32>
    %c0_5 = arith.constant 0 : index
    %c0_6 = arith.constant 0 : index
    %8 = vector.load %arg2[%c0_5, %c0_6] : memref<32x128xf32, #tpu.memory_space<vmem>>, vector<32x128xf32>
    %9 = arith.addf %8, %7 : vector<32x128xf32>
    %c0_7 = arith.constant 0 : index
    %c0_8 = arith.constant 0 : index
    %10 = vector.load %arg5[%c0_7, %c0_8] : memref<1x128xf32, #tpu.memory_space<vmem>>, vector<1x128xf32>
    %c0_9 = arith.constant 0 : index
    %c0_10 = arith.constant 0 : index
    %11 = vector.load %arg6[%c0_9, %c0_10] : memref<1x128xf32, #tpu.memory_space<vmem>>, vector<1x128xf32>
    %cst_11 = arith.constant dense<0.000000e+00> : vector<32xf32>
    %12 = vector.multi_reduction <add>, %9, %cst_11 [1] : vector<32x128xf32> to vector<32xf32>
    %13 = vector.shape_cast %12 : vector<32xf32> to vector<32x1xf32>
    %cst_12 = arith.constant 1.280000e+02 : f32
    %14 = vector.broadcast %cst_12 : f32 to vector<32x1xf32>
    %15 = arith.divf %13, %14 : vector<32x1xf32>
    %16 = vector.broadcast %15 : vector<32x1xf32> to vector<32x128xf32>
    %17 = arith.subf %9, %16 : vector<32x128xf32>
    %18 = arith.mulf %17, %17 : vector<32x128xf32>
    %cst_13 = arith.constant dense<0.000000e+00> : vector<32xf32>
    %19 = vector.multi_reduction <add>, %18, %cst_13 [1] : vector<32x128xf32> to vector<32xf32>
    %20 = vector.shape_cast %19 : vector<32xf32> to vector<32x1xf32>
    %cst_14 = arith.constant 1.280000e+02 : f32
    %21 = vector.broadcast %cst_14 : f32 to vector<32x1xf32>
    %22 = arith.divf %20, %21 : vector<32x1xf32>
    %23 = vector.broadcast %15 : vector<32x1xf32> to vector<32x128xf32>
    %24 = arith.subf %9, %23 : vector<32x128xf32>
    %cst_15 = arith.constant 9.99999974E-6 : f32
    %25 = vector.broadcast %cst_15 : f32 to vector<32x1xf32>
    %26 = arith.addf %22, %25 : vector<32x1xf32>
    %27 = math.rsqrt %26 : vector<32x1xf32>
    %28 = vector.broadcast %27 : vector<32x1xf32> to vector<32x128xf32>
    %29 = arith.mulf %24, %28 : vector<32x128xf32>
    %30 = vector.broadcast %10 : vector<1x128xf32> to vector<32x128xf32>
    %31 = arith.mulf %29, %30 : vector<32x128xf32>
    %32 = vector.broadcast %11 : vector<1x128xf32> to vector<32x128xf32>
    %33 = arith.addf %31, %32 : vector<32x128xf32>
    %c0_16 = arith.constant 0 : index
    %c0_17 = arith.constant 0 : index
    %34 = vector.load %arg7[%c0_16, %c0_17] : memref<32x128xf32, #tpu.memory_space<vmem>>, vector<32x128xf32>
    tpu.vector_store %arg7[%c0_16, %c0_17], %33 {strides = array<i32>} : memref<32x128xf32, #tpu.memory_space<vmem>>, vector<32x128xf32>,
    return
  }
  func.func @transform_0(%arg0: i32) -> (i32, i32) {
    %c0_i32 = arith.constant 0 : i32
    %c0_i32_0 = arith.constant 0 : i32
    return %arg0, %c0_i32 : i32, i32
  }
  func.func @transform_1(%arg0: i32) -> (i32, i32) {
    %c0_i32 = arith.constant 0 : i32
    %c0_i32_0 = arith.constant 0 : i32
    return %arg0, %c0_i32 : i32, i32
  }
  func.func @transform_2(%arg0: i32) -> (i32, i32) {
    %c0_i32 = arith.constant 0 : i32
    %c0_i32_0 = arith.constant 0 : i32
    %c0_i32_1 = arith.constant 0 : i32
    return %c0_i32, %c0_i32_0 : i32, i32
  }
  func.func @transform_3(%arg0: i32) -> (i32, i32) {
    %c0_i32 = arith.constant 0 : i32
    %c0_i32_0 = arith.constant 0 : i32
    %c0_i32_1 = arith.constant 0 : i32
    return %c0_i32, %c0_i32_0 : i32, i32
  }
  func.func @transform_4(%arg0: i32) -> (i32, i32) {
    %c0_i32 = arith.constant 0 : i32
    %c0_i32_0 = arith.constant 0 : i32
    %c0_i32_1 = arith.constant 0 : i32
    return %c0_i32, %c0_i32_0 : i32, i32
  }
  func.func @transform_5(%arg0: i32) -> (i32, i32) {
    %c0_i32 = arith.constant 0 : i32
    %c0_i32_0 = arith.constant 0 : i32
    %c0_i32_1 = arith.constant 0 : i32
    return %c0_i32, %c0_i32_0 : i32, i32
  }
  func.func @transform_6(%arg0: i32) -> (i32, i32) {
    %c0_i32 = arith.constant 0 : i32
    %c0_i32_0 = arith.constant 0 : i32
    return %arg0, %c0_i32 : i32, i32
  }
}

module attributes {stable_mosaic.version = 11 : i64} {
  func.func @_ffn_kernel(%arg0: i32, %arg1: memref<32x128xf32, #tpu.memory_space<vmem>>, %arg2: memref<128x256xf32, #tpu.memory_space<vmem>>, %arg3: memref<1x256xf32, #tpu.memory_space<vmem>>, %arg4: memref<256x128xf32, #tpu.memory_space<vmem>>, %arg5: memref<1x128xf32, #tpu.memory_space<vmem>>, %arg6: memref<1x128xf32, #tpu.memory_space<vmem>>, %arg7: memref<1x128xf32, #tpu.memory_space<vmem>>, %arg8: memref<32x128xf32, #tpu.memory_space<vmem>>) attributes {dimension_semantics = [#tpu.dimension_semantics<parallel>], iteration_bounds = array<i64: 1>, scalar_prefetch = 0 : i64, scratch_operands = 0 : i64, tpu.core_type = #tpu.core_type<tc>, window_params = [{transform_indices = @transform_0, window_bounds = array<i64: 32, 128>}, {pipeline_mode = #tpu.pipeline_mode<synchronous>, transform_indices = @transform_1, window_bounds = array<i64: 128, 256>}, {pipeline_mode = #tpu.pipeline_mode<synchronous>, transform_indices = @transform_2, window_bounds = array<i64: 1, 256>}, {pipeline_mode = #tpu.pipeline_mode<synchronous>, transform_indices = @transform_3, window_bounds = array<i64: 256, 128>}, {pipeline_mode = #tpu.pipeline_mode<synchronous>, transform_indices = @transform_4, window_bounds = array<i64: 1, 128>}, {pipeline_mode = #tpu.pipeline_mode<synchronous>, transform_indices = @transform_5, window_bounds = array<i64: 1, 128>}, {pipeline_mode = #tpu.pipeline_mode<synchronous>, transform_indices = @transform_6, window_bounds = array<i64: 1, 128>}, {transform_indices = @transform_7, window_bounds = array<i64: 32, 128>}]} {
    %c0 = arith.constant 0 : index
    %c0_0 = arith.constant 0 : index
    %0 = vector.load %arg1[%c0, %c0_0] : memref<32x128xf32, #tpu.memory_space<vmem>>, vector<32x128xf32>
    %1 = arith.truncf %0 : vector<32x128xf32> to vector<32x128xbf16>
    %c0_1 = arith.constant 0 : index
    %c0_2 = arith.constant 0 : index
    %2 = vector.load %arg2[%c0_1, %c0_2] : memref<128x256xf32, #tpu.memory_space<vmem>>, vector<128x256xf32>
    %3 = arith.truncf %2 : vector<128x256xf32> to vector<128x256xbf16>
    %cst = arith.constant dense<0.000000e+00> : vector<32x256xf32>
    %4 = tpu.matmul %1, %3, %cst {dimension_numbers = #tpu.dot_dimension_numbers<[1], [0], [0], [1], [0, 0, 1, 1], [], []>} : vector<32x128xbf16>, vector<128x256xbf16>, vector<32x256xf32> -> vector<32x256xf32>
    %c0_3 = arith.constant 0 : index
    %c0_4 = arith.constant 0 : index
    %5 = vector.load %arg3[%c0_3, %c0_4] : memref<1x256xf32, #tpu.memory_space<vmem>>, vector<1x256xf32>
    %6 = vector.broadcast %5 : vector<1x256xf32> to vector<32x256xf32>
    %7 = arith.addf %4, %6 : vector<32x256xf32>
    %cst_5 = arith.constant 0.000000e+00 : f32
    %8 = vector.broadcast %cst_5 : f32 to vector<32x256xf32>
    %9 = arith.maximumf %7, %8 : vector<32x256xf32>
    %10 = arith.truncf %9 : vector<32x256xf32> to vector<32x256xbf16>
    %c0_6 = arith.constant 0 : index
    %c0_7 = arith.constant 0 : index
    %11 = vector.load %arg4[%c0_6, %c0_7] : memref<256x128xf32, #tpu.memory_space<vmem>>, vector<256x128xf32>
    %12 = arith.truncf %11 : vector<256x128xf32> to vector<256x128xbf16>
    %cst_8 = arith.constant dense<0.000000e+00> : vector<32x128xf32>
    %13 = tpu.matmul %10, %12, %cst_8 {dimension_numbers = #tpu.dot_dimension_numbers<[1], [0], [0], [1], [0, 0, 1, 1], [], []>} : vector<32x256xbf16>, vector<256x128xbf16>, vector<32x128xf32> -> vector<32x128xf32>
    %c0_9 = arith.constant 0 : index
    %c0_10 = arith.constant 0 : index
    %14 = vector.load %arg5[%c0_9, %c0_10] : memref<1x128xf32, #tpu.memory_space<vmem>>, vector<1x128xf32>
    %15 = vector.broadcast %14 : vector<1x128xf32> to vector<32x128xf32>
    %16 = arith.addf %13, %15 : vector<32x128xf32>
    %17 = arith.addf %0, %16 : vector<32x128xf32>
    %c0_11 = arith.constant 0 : index
    %c0_12 = arith.constant 0 : index
    %18 = vector.load %arg6[%c0_11, %c0_12] : memref<1x128xf32, #tpu.memory_space<vmem>>, vector<1x128xf32>
    %c0_13 = arith.constant 0 : index
    %c0_14 = arith.constant 0 : index
    %19 = vector.load %arg7[%c0_13, %c0_14] : memref<1x128xf32, #tpu.memory_space<vmem>>, vector<1x128xf32>
    %cst_15 = arith.constant dense<0.000000e+00> : vector<32xf32>
    %20 = vector.multi_reduction <add>, %17, %cst_15 [1] : vector<32x128xf32> to vector<32xf32>
    %21 = vector.shape_cast %20 : vector<32xf32> to vector<32x1xf32>
    %cst_16 = arith.constant 1.280000e+02 : f32
    %22 = vector.broadcast %cst_16 : f32 to vector<32x1xf32>
    %23 = arith.divf %21, %22 : vector<32x1xf32>
    %24 = vector.broadcast %23 : vector<32x1xf32> to vector<32x128xf32>
    %25 = arith.subf %17, %24 : vector<32x128xf32>
    %26 = arith.mulf %25, %25 : vector<32x128xf32>
    %cst_17 = arith.constant dense<0.000000e+00> : vector<32xf32>
    %27 = vector.multi_reduction <add>, %26, %cst_17 [1] : vector<32x128xf32> to vector<32xf32>
    %28 = vector.shape_cast %27 : vector<32xf32> to vector<32x1xf32>
    %cst_18 = arith.constant 1.280000e+02 : f32
    %29 = vector.broadcast %cst_18 : f32 to vector<32x1xf32>
    %30 = arith.divf %28, %29 : vector<32x1xf32>
    %31 = vector.broadcast %23 : vector<32x1xf32> to vector<32x128xf32>
    %32 = arith.subf %17, %31 : vector<32x128xf32>
    %cst_19 = arith.constant 9.99999974E-6 : f32
    %33 = vector.broadcast %cst_19 : f32 to vector<32x1xf32>
    %34 = arith.addf %30, %33 : vector<32x1xf32>
    %35 = math.rsqrt %34 : vector<32x1xf32>
    %36 = vector.broadcast %35 : vector<32x1xf32> to vector<32x128xf32>
    %37 = arith.mulf %32, %36 : vector<32x128xf32>
    %38 = vector.broadcast %18 : vector<1x128xf32> to vector<32x128xf32>
    %39 = arith.mulf %37, %38 : vector<32x128xf32>
    %40 = vector.broadcast %19 : vector<1x128xf32> to vector<32x128xf32>
    %41 = arith.addf %39, %40 : vector<32x128xf32>
    %c0_20 = arith.constant 0 : index
    %c0_21 = arith.constant 0 : index
    %42 = vector.load %arg8[%c0_20, %c0_21] : memref<32x128xf32, #tpu.memory_space<vmem>>, vector<32x128xf32>
    tpu.vector_store %arg8[%c0_20, %c0_21], %41 {strides = array<i32>} : memref<32x128xf32, #tpu.memory_space<vmem>>, vector<32x128xf32>,
    return
  }
  func.func @transform_0(%arg0: i32) -> (i32, i32) {
    %c0_i32 = arith.constant 0 : i32
    %c0_i32_0 = arith.constant 0 : i32
    return %arg0, %c0_i32 : i32, i32
  }
  func.func @transform_1(%arg0: i32) -> (i32, i32) {
    %c0_i32 = arith.constant 0 : i32
    %c0_i32_0 = arith.constant 0 : i32
    %c0_i32_1 = arith.constant 0 : i32
    return %c0_i32, %c0_i32_0 : i32, i32
  }
  func.func @transform_2(%arg0: i32) -> (i32, i32) {
    %c0_i32 = arith.constant 0 : i32
    %c0_i32_0 = arith.constant 0 : i32
    %c0_i32_1 = arith.constant 0 : i32
    return %c0_i32, %c0_i32_0 : i32, i32
  }
  func.func @transform_3(%arg0: i32) -> (i32, i32) {
    %c0_i32 = arith.constant 0 : i32
    %c0_i32_0 = arith.constant 0 : i32
    %c0_i32_1 = arith.constant 0 : i32
    return %c0_i32, %c0_i32_0 : i32, i32
  }
  func.func @transform_4(%arg0: i32) -> (i32, i32) {
    %c0_i32 = arith.constant 0 : i32
    %c0_i32_0 = arith.constant 0 : i32
    %c0_i32_1 = arith.constant 0 : i32
    return %c0_i32, %c0_i32_0 : i32, i32
  }
  func.func @transform_5(%arg0: i32) -> (i32, i32) {
    %c0_i32 = arith.constant 0 : i32
    %c0_i32_0 = arith.constant 0 : i32
    %c0_i32_1 = arith.constant 0 : i32
    return %c0_i32, %c0_i32_0 : i32, i32
  }
  func.func @transform_6(%arg0: i32) -> (i32, i32) {
    %c0_i32 = arith.constant 0 : i32
    %c0_i32_0 = arith.constant 0 : i32
    %c0_i32_1 = arith.constant 0 : i32
    return %c0_i32, %c0_i32_0 : i32, i32
  }
  func.func @transform_7(%arg0: i32) -> (i32, i32) {
    %c0_i32 = arith.constant 0 : i32
    %c0_i32_0 = arith.constant 0 : i32
    return %arg0, %c0_i32 : i32, i32
  }
}

</mosaic_0001>

<bundles_post_ra>
// kernel: decoder_layer_forward.7
= control target key start
LH: loop header
LB: loop body
LE: loop exit
PB: predicated region body
PF: predicated region fallthrough
CT: control target
= control target key end

     0   :  { %vm112_vm0 = vcmask 392192   ;;  %s264_s2 = inlined_call_operand.vmem [shape: f32[128,48], index: 2, kind: input, shape index: {}]   ;;  %s265_s0 = inlined_call_operand.vmem [shape: f32[32,128], index: 0, kind: input, shape index: {}]   ;;  %s266_s1 = inlined_call_operand.vmem [shape: f32[32,128], index: 1, kind: input, shape index: {}]   ;;  %s267_s3 = inlined_call_operand.vmem [shape: f32[1,48], index: 3, kind: input, shape index: {}]   ;;  %s268_s4 = inlined_call_operand.vmem [shape: f32[32,48], index: 4, kind: output, shape index: {}]  }
   0x1   :  { %v32_v0 = vld [vmem:[%s264_s2] sm:$0xff]  ;;  %v33_v1 = vld [vmem:[%s264_s2 + $0x8] sm:$0xff]  ;;  %v34_v2 = vld [vmem:[%s264_s2 + $0x10] sm:$0xff] }
   0x2   :  { %v48_v3 = vpack.c.bf16 %v33_v1, %v32_v0  ;;  %v35_v4 = vld [vmem:[%s264_s2 + $0x18] sm:$0xff]  ;;  %v36_v6 = vld [vmem:[%s264_s2 + $0x20] sm:$0xff]  ;;  %v37_v7 = vld [vmem:[%s264_s2 + $0x28] sm:$0xff] }
   0x3   :  { %v49_v5 = vpack.c.bf16 %v35_v4, %v34_v2  ;;  %v50_v8 = vpack.c.bf16 %v37_v7, %v36_v6  ;;  %v38_v9 = vld [vmem:[%s264_s2 + $0x30] sm:$0xff]  ;;  %v18_v10 = vld [vmem:[%s265_s0] sm:$0xff]  ;;  %v19_v11 = vld [vmem:[%s265_s0 + $0x8] sm:$0xff] }
   0x4   :  { %132 = vmatprep.subr.bf16.mxu0 %v48_v3  ;;  %v39_v12 = vld [vmem:[%s264_s2 + $0x38] sm:$0xff]  ;;  %v22_v13 = vld [vmem:[%s266_s1] sm:$0xff]  ;;  %v23_v14 = vld [vmem:[%s266_s1 + $0x8] sm:$0xff] }
   0x5   :  { %133 = vmatpush3.bf16.msra.mxu0 %v48_v3  ;;  %v26_v15 = vadd.f32 %v22_v13, %v18_v10  ;;  %v27_v16 = vadd.f32 %v23_v14, %v19_v11  ;;  %v51_v17 = vpack.c.bf16 %v39_v12, %v38_v9  ;;  %v40_v19 = vld [vmem:[%s264_s2 + $0x40] sm:$0xff]  ;;  %v41_v20 = vld [vmem:[%s264_s2 + $0x48] sm:$0xff]  ;;  %v42_v22 = vld [vmem:[%s264_s2 + $0x50] sm:$0xff] }
   0x6   :  { %134 = vmatprep.subr.bf16.mxu0 %v49_v5  ;;  %v52_v21 = vpack.c.bf16 %v41_v20, %v40_v19  ;;  %v43_v23 = vld [vmem:[%s264_s2 + $0x58] sm:$0xff]  ;;  %v44_v25 = vld [vmem:[%s264_s2 + $0x60] sm:$0xff]  ;;  %v45_v26 = vld [vmem:[%s264_s2 + $0x68] sm:$0xff] }
   0x7   :  { %v30_v18 = vpack.c.bf16 %v27_v16, %v26_v15  ;;  %v53_v24 = vpack.c.bf16 %v43_v23, %v42_v22  ;;  %v54_v27 = vpack.c.bf16 %v45_v26, %v44_v25  ;;  %v46_v28 = vld [vmem:[%s264_s2 + $0x70] sm:$0xff]  ;;  %v47_v29 = vld [vmem:[%s264_s2 + $0x78] sm:$0xff]  ;;  %v121_v38 = vld [vmem:[%s267_s3] ss:$0 sm:$0xff] }
   0x8   :  { %v20_v30 = vld [vmem:[%s265_s0 + $0x10] sm:$0xff]  ;;  %v21_v31 = vld [vmem:[%s265_s0 + $0x18] sm:$0xff]  ;;  %v55_v34 = vpack.c.bf16 %v47_v29, %v46_v28 }
   0x9   :  { %135 = vmatpush3.bf16.msra.mxu0 %v49_v5  ;;  %148 = vmatprep.mubr.bf16.mxu0 %v30_v18  ;;  %v24_v32 = vld [vmem:[%s266_s1 + $0x10] sm:$0xff]  ;;  %v25_v33 = vld [vmem:[%s266_s1 + $0x18] sm:$0xff] }
   0xa   :  { %136 = vmatprep.subr.bf16.mxu0 %v50_v8  ;;  %v28_v35 = vadd.f32 %v24_v32, %v20_v30  ;;  %v29_v36 = vadd.f32 %v25_v33, %v21_v31 }
   0xc   :  { %v31_v37 = vpack.c.bf16 %v29_v36, %v28_v35 }
   0xd   :  { %137 = vmatpush3.bf16.msra.mxu0 %v50_v8 }
   0xe   :  { %138 = vmatprep.subr.bf16.mxu0 %v51_v17 }
  0x11   :  { %139 = vmatpush3.bf16.msra.mxu0 %v51_v17 }
  0x12   :  { %140 = vmatprep.subr.bf16.mxu0 %v52_v21 }
  0x15   :  { %141 = vmatpush3.bf16.msra.mxu0 %v52_v21 }
  0x16   :  { %142 = vmatprep.subr.bf16.mxu0 %v53_v24 }
  0x19   :  { %143 = vmatpush3.bf16.msra.mxu0 %v53_v24 }
  0x1a   :  { %144 = vmatprep.subr.bf16.mxu0 %v54_v27 }
  0x1d   :  { %145 = vmatpush3.bf16.msra.mxu0 %v54_v27 }
  0x1e   :  { %146 = vmatprep.subr.bf16.mxu0 %v55_v34 }
  0x21   :  { %147 = vmatpush3.bf16.msra.mxu0 %v55_v34 }
  0x24   :  { %149 = vmatmul.mubr.bf16.vlgmr.msra.gmra.mrb[0].mxu0 %v31_v37 }
  0xf7   :  { %v150_v39 = vpop.f32.mrb[0].mxu0 }
  0xf8   :  { %v106_v40 = vadd.f32 %v150_v39, %v121_v38  ;;  %v97_v41 = vpop.f32.mrb[1].mxu0 }
  0xf9   :  { %v98_v42 = vadd.f32 %v121_v38, %v97_v41  ;;  %v151_v43 = vpop.f32.mrb[2].mxu0 }
  0xfa   :  { %115 = vst.msk [vmem:[%s268_s4 + $0x10] sm:$0xff] %vm112_vm0, %v106_v40  ;;  %v109_v44 = vadd.f32 %v151_v43, %v121_v38  ;;  %v100_v45 = vpop.f32.mrb[3].mxu0 }
  0xfb   :  { %113 = vst.msk [vmem:[%s268_s4] sm:$0xff] %vm112_vm0, %v98_v42  ;;  %v101_v46 = vadd.f32 %v121_v38, %v100_v45 }
  0xfc   :  { %116 = vst.msk [vmem:[%s268_s4 + $0x18] sm:$0xff] %vm112_vm0, %v109_v44 }
  0xfd   :  { %114 = vst.msk [vmem:[%s268_s4 + $0x8] sm:$0xff] %vm112_vm0, %v101_v46 }

// kernel: decoder_layer_forward.5
= control target key start
LH: loop header
LB: loop body
LE: loop exit
PB: predicated region body
PF: predicated region fallthrough
CT: control target
= control target key end

     0   :  { %16 = vsyncpa [#allocation3], 0  ;;  %s2091_s0 = inlined_call_operand.vmem [shape: f32[2,16,128], index: 0, kind: input, shape index: {}]   ;;  %s2092_s1 = inlined_call_operand.vmem [shape: f32[2,16,128], index: 1, kind: input, shape index: {}]   ;;  %s2093_s2 = inlined_call_operand.vmem [shape: f32[16,16], index: 2, kind: input, shape index: {}]   ;;  %s2094_s3 = inlined_call_operand.hbm [shape: f32[128,256], index: 3, kind: input, shape index: {}]   ;;  %s2095_s4 = inlined_call_operand.vmem [shape: f32[1,256], index: 4, kind: input, shape index: {}]   ;;  %s2096_s5 = inlined_call_operand.hbm [shape: f32[128,128], index: 5, kind: input, shape index: {}]   ;;  %s2097_s6 = inlined_call_operand.vmem [shape: f32[1,128], index: 6, kind: input, shape index: {}]   ;;  %s2098_s7 = inlined_call_operand.hbm [shape: f32[128,128], index: 7, kind: input, shape index: {}]   ;;  %s2099_s8 = inlined_call_operand.vmem [shape: f32[1,128], index: 8, kind: input, shape index: {}]   ;;  %s2100_s9 = inlined_call_operand.vmem [shape: f32[1,128], index: 9, kind: input, shape index: {}]   ;;  %s2101_s10 = inlined_call_operand.vmem [shape: f32[1,128], index: 10, kind: input, shape index: {}]   ;;  %s2102_s11 = inlined_call_operand.vmem [shape: f32[2,16,128], index: 11, kind: output, shape index: {}]  }
   0x1   :  { %17 = vsyncpa [#allocation5], 0  ;;  %s1815_s17 = smov 0  }
   0x2 LB: > { %s1742_s18 = smov [#allocation4]   ;;  %s1821_s20 = sadd.s32 4294967295, %s1740_s17   ;;  %s1740_s17 = sphi %s1815_s17, %s23_s17  }
   0x3   : > { %s326_s19 = sshll.u32 %s1742_s18, 4  ;;  %p1388_p0 = scmp.ge.s32.totalorder %s1740_s17, 1  ;;  %s1830_s19 = int_to_ptr.vmem [resolvable:$true] %s326_s19 }
   0x4   : > { %p295_p1 = scmp.lt.s32.totalorder %s1740_s17, 3  ;;  %p2104_p2 = scmp.eq.s32.totalorder %s1821_s20, 0 }
   0x5   : > { %s1743_s22 = smov [#allocation2]   ;;  %s1744_s25 = smov [#allocation6]  }
   0x6   : > { %p1826_p3 = pnand %p1388_p0, %p295_p1  ;;  %s310_s23 = sshll.u32 %s1743_s22, 4  ;;  %s1834_s23 = int_to_ptr.vmem [resolvable:$true] %s310_s23 }
   0x7   : > { %s1842_s26 = sshll.u32 %s1744_s25, 4  ;;  %s1642_s29 = scalar_lea.hbm %s2096_s5, 2048  ;;  %s343_s26 = int_to_ptr.vmem [resolvable:$true] %s1842_s26 }
   0x8   : > { %s2106_s21 = scalar_select %p1826_p3, 1, 0 }
   0x9   : > { %p1554_p4 = pneg %p1826_p3  ;;  %p1643_p6 = scmp.ne.s32.totalorder %s2096_s5, %s1642_s29 }
   0xa   : > { %p1649_p10 = scmp.lt.u32.totalorder %s1642_s29, %s2096_s5 }
   0xb   : > { %p1838_p5 = pnand %p2104_p2, %p1554_p4 }
   0xd   : > { %p1852_p7 = pneg %p1838_p5 }
   0xf   : > { %p1645_p8 = pnand %p1852_p7, %p1643_p6 }
  0x11   : > { %p1646_p9 = pneg %p1645_p8 }
  0x13   : > { %p1651_p11 = pnand %p1649_p10, %p1646_p9 }
  0x15   : > { %1654 = shalt.err (!%p1651_p11)
}
  0x16   : > { %s1655_s16 = scalar_lea.vmem %s1830_s19, 2048  ;;  %p1663_p1 = scmp.lt.s32.totalorder %s1830_s19, %s1830_s19 }
  0x17   : > { %p1656_p12 = scmp.ne.s32.totalorder %s1830_s19, %s1655_s16  ;;  %p1664_p4 = scmp.lt.s32.totalorder %s1655_s16, %s1655_s16 }
  0x19   : > { %p1658_p13 = pnand %p1656_p12, %p1852_p7  ;;  %p1665_p6 = por %p1664_p4, %p1663_p1 }
  0x1b   : > { %p1659_p0 = pneg %p1658_p13 }
  0x1d   : > { %p1666_p8 = pnand %p1665_p6, %p1659_p0 }
  0x1f   : > { %1669 = shalt.err (!%p1666_p8)
}
  0x20   : > { %s2103_s18 = smov 128   ;;  %s1746_s22 = smov 8  }
  0x21   : > { %1560 = dma.hbm_to_vmem [thread:$0]  (!%p1838_p5), %s2096_s5, 2048, %s1830_s19, [#allocation5], %s2103_s18, %s2103_s18, %s1746_s22  }
  0x22   : > { %s1670_s30 = scalar_lea.hbm %s2094_s3, 4096 }
  0x23   : > { %p1671_p9 = scmp.ne.s32.totalorder %s2094_s3, %s1670_s30  ;;  %p1677_p12 = scmp.lt.u32.totalorder %s1670_s30, %s2094_s3 }
  0x25   : > { %p1673_p10 = pnand %p1671_p9, %p1852_p7 }
  0x27   : > { %p1674_p11 = pneg %p1673_p10 }
  0x29   : > { %p1679_p13 = pnand %p1677_p12, %p1674_p11 }
  0x2b   : > { %1682 = shalt.err (!%p1679_p13)
}
  0x2c   : > { %s1683_s19 = scalar_lea.vmem %s1834_s23, 4096  ;;  %p1691_p6 = scmp.lt.s32.totalorder %s1834_s23, %s1834_s23 }
  0x2d   : > { %p1684_p0 = scmp.ne.s32.totalorder %s1834_s23, %s1683_s19  ;;  %p1692_p8 = scmp.lt.s32.totalorder %s1683_s19, %s1683_s19 }
  0x2f   : > { %p1686_p1 = pnand %p1684_p0, %p1852_p7  ;;  %p1693_p9 = por %p1692_p8, %p1691_p6 }
  0x31   : > { %p1687_p4 = pneg %p1686_p1 }
  0x33   : > { %p1694_p10 = pnand %p1693_p9, %p1687_p4 }
  0x35   : > { %1697 = shalt.err (!%p1694_p10)
}
  0x36   : > { %s1747_s25 = smov 256   ;;  %s1748_s27 = smov 16  }
  0x37   : > { %1557 = dma.hbm_to_vmem [thread:$0]  (!%p1838_p5), %s2094_s3, 4096, %s1834_s23, [#allocation3], %s1747_s25, %s1747_s25, %s1748_s27  }
  0x38   : > { %s1698_s14 = scalar_lea.hbm %s2098_s7, 2048 }
  0x39   : > { %p1699_p11 = scmp.ne.s32.totalorder %s2098_s7, %s1698_s14  ;;  %p1705_p0 = scmp.lt.u32.totalorder %s1698_s14, %s2098_s7 }
  0x3b   : > { %p1701_p12 = pnand %p1699_p11, %p1852_p7 }
  0x3d   : > { %p1702_p13 = pneg %p1701_p12 }
  0x3f   : > { %p1707_p1 = pnand %p1705_p0, %p1702_p13 }
  0x41   : > { %1710 = shalt.err (!%p1707_p1)
}
  0x42   : > { %s1711_s28 = scalar_lea.vmem %s343_s26, 2048  ;;  %p1719_p9 = scmp.lt.s32.totalorder %s343_s26, %s343_s26 }
  0x43   : > { %p1712_p4 = scmp.ne.s32.totalorder %s343_s26, %s1711_s28  ;;  %p1720_p10 = scmp.lt.s32.totalorder %s1711_s28, %s1711_s28 }
  0x45   : > { %p1714_p6 = pnand %p1712_p4, %p1852_p7  ;;  %p1721_p2 = por %p1720_p10, %p1719_p9 }
  0x47   : > { %p1715_p8 = pneg %p1714_p6 }
  0x49   : > { %p1722_p3 = pnand %p1721_p2, %p1715_p8 }
  0x4b   : > { %1725 = shalt.err (!%p1722_p3)
}
  0x4c   : > { %s2109_s23 = smov 128   ;;  %p2110_p11 = scmp.ne.s32.totalorder %s2106_s21, 0 }
  0x4d   : > { %1563 = dma.hbm_to_vmem [thread:$0]  (!%p1838_p5), %s2098_s7, 2048, %s343_s26, [#allocation5], %s2109_s23, %s2109_s23, %s1746_s22  }
  0x4e   : > { %383 = sbr.rel (%p2110_p11) target bundleno = 2328 (0x918), region = 64  ;;  %p2111_p7 = scmp.eq.s32.totalorder (!%p2110_p11), %s1821_s20, 0 }
  0x55   : > { %1731 = dma.done.wait (%p2111_p7), [#allocation3], 4096   ;;  %p2112_p12 = pmov %p2111_p7 }
  0x56   : > { %p2113_p2 = pmov %p2111_p7 }
  0x57   : > { %1733 = vsyncadd (%p2112_p12), [#allocation3], 4294963200 }
  0x58   : > { %1735 = dma.done.wait (%p2113_p2), [#allocation5], 4096   ;;  %p2114_p3 = pmov %p2113_p2 }
  0x59   : > { %v1749_v0 = vmov 0   ;;  %v1750_v1 = vmov 0.0   ;;  %v460_v2 = vld [vmem:[#allocation2 + $0x8] sm:$0xff]  ;;  %v462_v3 = vld [vmem:[#allocation2 + $0x18] sm:$0xff]  ;;  %v459_v4 = vld [vmem:[#allocation2] sm:$0xff]  ;;  %p436_p5 = scmp.lt.s32.totalorder %s1821_s20, 1 }
  0x5a   : > { %1737 = vsyncadd (%p2114_p3), [#allocation5], 4294963200  ;;  %551 = vmatprep.mubr.bf16.mxu0 %v1749_v0  ;;  %1454 = vmatprep.subr.bf16.mxu1 %v1750_v1  ;;  %v492_v5 = vpack.c.bf16 %v462_v3, %v460_v2  ;;  %v461_v6 = vld [vmem:[#allocation2 + $0x10] sm:$0xff]  ;;  %v464_v7 = vld [vmem:[#allocation2 + $0x28] sm:$0xff]  ;;  %vm1751_vm0 = vmmov 0   ;;  %vm639_vm1 = vcmask 261120  }
  0x5b   : > { %v466_v8 = vld [vmem:[#allocation2 + $0x38] sm:$0xff]  ;;  %v491_v9 = vpack.c.bf16 %v461_v6, %v459_v4  ;;  %v463_v11 = vld [vmem:[#allocation2 + $0x20] sm:$0xff]  ;;  %v465_v12 = vld [vmem:[#allocation2 + $0x30] sm:$0xff]  ;;  %s2116_s20 = smov (!%p436_p5, %s1821_s20), 1  ;;  %1470 = vmatprep.mubr.msk.bf16.mxu1 %vm1751_vm0, %v1750_v1  ;;  %vm691_vm2 = vcmask 130048   ;;  %s1752_s23 = smov 96  }
  0x5c   : > { %v494_v10 = vpack.c.bf16 %v466_v8, %v464_v7  ;;  %v468_v13 = vld [vmem:[#allocation2 + $0x48] sm:$0xff]  ;;  %519 = vmatprep.subr.bf16.mxu0 %v492_v5  ;;  %v470_v14 = vld [vmem:[#allocation2 + $0x58] sm:$0xff]  ;;  %v493_v15 = vpack.c.bf16 %v465_v12, %v463_v11  ;;  %v467_v17 = vld [vmem:[#allocation2 + $0x40] sm:$0xff]  ;;  %s1935_s21 = sshll.u32 %s2116_s20, 4  ;;  %s1753_s18 = smov 32   ;;  %vm1164_vm3 = vcmask 523264  }
  0x5d   : > { %520 = vmatpush1.bf16.msra.mxu0 %v491_v9  ;;  %v496_v16 = vpack.c.bf16 %v470_v14, %v468_v13  ;;  %v469_v18 = vld [vmem:[#allocation2 + $0x50] sm:$0xff]  ;;  %v472_v19 = vld [vmem:[#allocation2 + $0x68] sm:$0xff]  ;;  %v474_v20 = vld [vmem:[#allocation2 + $0x78] sm:$0xff]  ;;  %s440_s13 = scalar_lea.vmem %s2091_s0, %s1935_s21  ;;  %s445_s29 = scalar_lea.vmem %s2092_s1, %s1935_s21  ;;  %vm1167_vm4 = vcmask 785408  }
  0x5e   : > { %521 = vmatprep.subr.bf16.mxu0 %v494_v10  ;;  %v495_v21 = vpack.c.bf16 %v469_v18, %v467_v17  ;;  %v498_v22 = vpack.c.bf16 %v474_v20, %v472_v19  ;;  %v471_v23 = vld [vmem:[#allocation2 + $0x60] sm:$0xff]  ;;  %v473_v24 = vld [vmem:[#allocation2 + $0x70] sm:$0xff]  ;;  %v476_v25 = vld [vmem:[#allocation2 + $0x88] sm:$0xff]  ;;  %v509_v19 = vlaneseq  ;;  %s1754_s25 = smov 64   ;;  %s450_s12 = scalar_lea.vmem %s2102_s11, %s1935_s21 }
  0x5f   : > { %v478_v26 = vld [vmem:[#allocation2 + $0x98] sm:$0xff]  ;;  %v497_v27 = vpack.c.bf16 %v473_v24, %v471_v23  ;;  %v563_v28 = vld [vmem:[#allocation4] sm:$0xff]  ;;  %v564_v29 = vld [vmem:[#allocation4 + $0x8] sm:$0xff] }
  0x60   : > { %v565_v30 = vld [vmem:[#allocation4 + $0x10] sm:$0xff]  ;;  %v500_v31 = vpack.c.bf16 %v478_v26, %v476_v25  ;;  %v475_v32 = vld [vmem:[#allocation2 + $0x80] sm:$0xff]  ;;  %v579_v34 = vpack.c.bf16 %v564_v29, %v563_v28  ;;  %v566_v35 = vld [vmem:[#allocation4 + $0x18] sm:$0xff]  ;;  %v510_v20 = vshrl.u32 %v509_v19, 7 }
  0x61   : > { %522 = vmatpush1.bf16.msra.mxu0 %v493_v15  ;;  %v477_v33 = vld [vmem:[#allocation2 + $0x90] sm:$0xff]  ;;  %v480_v36 = vld [vmem:[#allocation2 + $0xa8] sm:$0xff]  ;;  %v482_v37 = vld [vmem:[#allocation2 + $0xb8] sm:$0xff]  ;;  %v580_v38 = vpack.c.bf16 %v566_v35, %v565_v30 }
  0x62   : > { %523 = vmatprep.subr.bf16.mxu0 %v496_v16  ;;  %1455 = vmatpush3.bf16.msra.mxu1 %v579_v34  ;;  %v499_v39 = vpack.c.bf16 %v477_v33, %v475_v32  ;;  %v567_v40 = vld [vmem:[#allocation4 + $0x20] sm:$0xff]  ;;  %v568_v41 = vld [vmem:[#allocation4 + $0x28] sm:$0xff]  ;;  %v502_v42 = vpack.c.bf16 %v482_v37, %v480_v36  ;;  %v481_v44 = vld [vmem:[#allocation2 + $0xb0] sm:$0xff]  ;;  %v515_v23 = vsub.s32 1, %v510_v20 }
  0x63   : > { %1456 = vmatprep.subr.bf16.mxu1 %v1750_v1  ;;  %v479_v43 = vld [vmem:[#allocation2 + $0xa0] sm:$0xff]  ;;  %v484_v45 = vld [vmem:[#allocation2 + $0xc8] sm:$0xff]  ;;  %v486_v46 = vld [vmem:[#allocation2 + $0xd8] sm:$0xff]  ;;  %v581_v47 = vpack.c.bf16 %v568_v41, %v567_v40 }
  0x64   : > { %v501_v48 = vpack.c.bf16 %v481_v44, %v479_v43  ;;  %v569_v49 = vld [vmem:[#allocation4 + $0x30] sm:$0xff]  ;;  %v570_v50 = vld [vmem:[#allocation4 + $0x38] sm:$0xff]  ;;  %v504_v51 = vpack.c.bf16 %v486_v46, %v484_v45  ;;  %v483_v52 = vld [vmem:[#allocation2 + $0xc0] sm:$0xff] }
  0x65   : > { %524 = vmatpush1.bf16.msra.mxu0 %v495_v21  ;;  %v485_v53 = vld [vmem:[#allocation2 + $0xd0] sm:$0xff]  ;;  %v488_v54 = vld [vmem:[#allocation2 + $0xe8] sm:$0xff]  ;;  %v490_v55 = vld [vmem:[#allocation2 + $0xf8] sm:$0xff]  ;;  %v582_v59 = vpack.c.bf16 %v570_v50, %v569_v49  ;;  %v511_v21 = vsub.s32 0, %v510_v20 }
  0x66   : > { %525 = vmatprep.subr.bf16.mxu0 %v498_v22  ;;  %1457 = vmatpush3.bf16.msra.mxu1 %v580_v38  ;;  %v1946_v56 = vld [vmem:[%s440_s13] sm:$0xff]  ;;  %v1948_v57 = vld [vmem:[%s440_s13 + $0x8] sm:$0xff]  ;;  %v503_v60 = vpack.c.bf16 %v485_v53, %v483_v52  ;;  %v506_v0 = vpack.c.bf16 %v490_v55, %v488_v54  ;;  %v489_v3 = vld [vmem:[#allocation2 + $0xf0] sm:$0xff] }
  0x67   : > { %1458 = vmatprep.subr.bf16.mxu1 %v1750_v1  ;;  %v454_v58 = vld [vmem:[%s445_s29] sm:$0xff]  ;;  %v455_v61 = vld [vmem:[%s445_s29 + $0x8] sm:$0xff]  ;;  %v573_v8 = vld [vmem:[#allocation4 + $0x50] sm:$0xff]  ;;  %v562_v18 = vpack.c.bf16 %v1948_v57, %v1946_v56 }
  0x68   : > { %v571_v62 = vld [vmem:[#allocation4 + $0x40] sm:$0xff]  ;;  %v572_v63 = vld [vmem:[#allocation4 + $0x48] sm:$0xff]  ;;  %v456_v4 = vadd.f32 %v454_v58, %v1946_v56  ;;  %v457_v5 = vadd.f32 %v455_v61, %v1948_v57  ;;  %v574_v9 = vld [vmem:[#allocation4 + $0x58] sm:$0xff] }
  0x69   : > { %526 = vmatpush1.bf16.msra.mxu0 %v497_v27  ;;  %v487_v2 = vld [vmem:[#allocation2 + $0xe0] sm:$0xff]  ;;  %v583_v6 = vpack.c.bf16 %v572_v63, %v571_v62  ;;  %v584_v11 = vpack.c.bf16 %v574_v9, %v573_v8  ;;  %v576_v13 = vld [vmem:[#allocation4 + $0x68] sm:$0xff]  ;;  %v577_v15 = vld [vmem:[#allocation4 + $0x70] sm:$0xff] }
  0x6a   : > { %527 = vmatprep.subr.bf16.mxu0 %v500_v31  ;;  %1459 = vmatpush3.bf16.msra.mxu1 %v581_v47  ;;  %v505_v7 = vpack.c.bf16 %v489_v3, %v487_v2  ;;  %v458_v10 = vpack.c.bf16 %v457_v5, %v456_v4  ;;  %v575_v12 = vld [vmem:[#allocation4 + $0x60] sm:$0xff]  ;;  %v578_v16 = vld [vmem:[#allocation4 + $0x78] sm:$0xff]  ;;  %v1990_v50 = vld [vmem:[%s2093_s2 + $0x8] sm:$0xff] }
  0x6b   : > { %1460 = vmatprep.subr.bf16.mxu1 %v1750_v1  ;;  %v585_v14 = vpack.c.bf16 %v576_v13, %v575_v12  ;;  %v586_v17 = vpack.c.bf16 %v578_v16, %v577_v15  ;;  %v507_v22 = vld [vmem:[%s2095_s4] sm:$0x3] }
  0x6c   : > { %v512_v24 = vrot.slane %v507_v22, %v511_v21  ;;  %v516_v26 = vrot.slane %v507_v22, %v515_v23  ;;  %v1403_v37 = vld [vmem:[%s2097_s6] ss:$0 sm:$0xff] }
  0x6d   : > { %528 = vmatpush1.bf16.msra.mxu0 %v499_v39  ;;  %v1985_v46 = vld [vmem:[%s2093_s2] sm:$0xff] }
  0x6e   : > { %529 = vmatprep.subr.bf16.mxu0 %v502_v42  ;;  %1461 = vmatpush3.bf16.msra.mxu1 %v582_v59 }
  0x6f   : > { %1462 = vmatprep.subr.bf16.mxu1 %v1750_v1 }
  0x71   : > { %530 = vmatpush1.bf16.msra.mxu0 %v501_v48 }
  0x72   : > { %531 = vmatprep.subr.bf16.mxu0 %v504_v51  ;;  %1463 = vmatpush3.bf16.msra.mxu1 %v583_v6 }
  0x73   : > { %1464 = vmatprep.subr.bf16.mxu1 %v1750_v1 }
  0x75   : > { %532 = vmatpush1.bf16.msra.mxu0 %v503_v60 }
  0x76   : > { %533 = vmatprep.subr.bf16.mxu0 %v506_v0  ;;  %1465 = vmatpush3.bf16.msra.mxu1 %v584_v11 }
  0x77   : > { %1466 = vmatprep.subr.bf16.mxu1 %v1750_v1 }
  0x79   : > { %534 = vmatpush1.bf16.msra.mxu0 %v505_v7 }
  0x7a   : > { %1498 = vmatprep.subr.bf16.mxu0 %v1750_v1  ;;  %1467 = vmatpush3.bf16.msra.mxu1 %v585_v14 }
  0x7b   : > { %1468 = vmatprep.subr.bf16.mxu1 %v1750_v1 }
  0x7c   : > { %552 = vmatmul.mubr.bf16.vlgmr.msra.gmra.mrb[0].mxu0 %v458_v10 }
  0x7d   : > { %1500 = vmatprep.mubr.msk.bf16.mxu0 %vm1751_vm0, %v1750_v1 }
  0x7e   : > { %1469 = vmatpush3.bf16.msra.mxu1 %v586_v17 }
  0x7f   : > { %1474 = vmatprep.subr.bf16.mxu1 %v1750_v1 }
  0x81   : > { %1471 = vmatmul.mubr.bf16.vlgmr.msra.gmra.mrb[0].mxu1 %v562_v18 }
  0x82   : > { %1476 = vmatprep.mubr.msk.bf16.mxu1 %vm1751_vm0, %v1750_v1 }
 0x14f   : > { %v553_v25 = vpop.f32.mrb[0].mxu0 }
 0x150   : > { %v555_v27 = vpop.f32.mrb[1].mxu0  ;;  %v554_v29 = vadd.f32 %v553_v25, %v512_v24 }
 0x151   : > { %v557_v28 = vpop.f32.mrb[2].mxu0  ;;  %v556_v32 = vadd.f32 %v555_v27, %v516_v26 }
 0x152   : > { %v558_v30 = vadd.f32 %v557_v28, %v512_v24  ;;  %v559_v31 = vpop.f32.mrb[3].mxu0 }
 0x153   : > { %v560_v33 = vadd.f32 %v559_v31, %v516_v26 }
 0x154   : > { %v637_v34 = vpack.c.bf16 %v558_v30, %v554_v29  ;;  %v628_v38 = vpop.f32.mrb[0].mxu1 }
 0x155   : > { %v638_v35 = vpack.c.bf16 %v560_v33, %v556_v32  ;;  %v629_v39 = vadd.f32 %v1403_v37, %v628_v38  ;;  %v1472_v40 = vpop.f32.mrb[1].mxu1 }
 0x156   : > { %v631_v41 = vpop.f32.mrb[2].mxu1 }
 0x157   : > { %v644_v36 = vsel %vm639_vm1, %v638_v35, 0  ;;  %v632_v42 = vadd.f32 %v1403_v37, %v631_v41  ;;  %v1473_v43 = vpop.f32.mrb[3].mxu1 }
 0x158   : > { %1475 = vmatpush3.bf16.xpose.msra.mxu1 %v644_v36 }
 0x159   : > { %1480 = vmatprep.subr.bf16.mxu1 %v1750_v1  ;;  %v1978_v44 = vpack.c.bf16 %v632_v42, %v629_v39 }
 0x15f   : > { %1477 = vmatmul.mubr.msk.bf16.vlgmr.msra.gmra.mrb[4].mxu1 %vm639_vm1, %v637_v34 }
 0x160   : > { %1482 = vmatprep.mubr.msk.bf16.mxu1 %vm1751_vm0, %v1750_v1  ;;  %1481 = vmatpush3.bf16.msra.mxu1 %v1978_v44 }
 0x161   : > { %1486 = vmatprep.subr.bf16.mxu1 %v1750_v1 }
 0x232   : > { %v680_v45 = vpop.f32.mrb[4].mxu1 }
 0x233   : > { %v687_v47 = vmul.f32 0.17677669, %v680_v45  ;;  %v1478_v48 = vpop.f32.mrb[5].mxu1 }
 0x234   : > { %v683_v49 = vpop.f32.mrb[6].mxu1 }
 0x235   : > { %v688_v51 = vmul.f32 0.17677669, %v683_v49  ;;  %v1479_v52 = vpop.f32.mrb[7].mxu1  ;;  %v689_v53 = vadd.f32 %v687_v47, %v1985_v46 }
 0x237   : > { %v692_v54 = vsel %vm691_vm2, %v689_v53, -inf  ;;  %v690_v55 = vadd.f32 %v688_v51, %v1990_v50 }
 0x238   : > { %693 = vmax.xlane.f32.xlu0 %v692_v54 }
 0x239   : > { %v695_v58 = vsel %vm691_vm2, %v690_v55, -inf }
 0x23c   : > { %696 = vmax.xlane.f32.xlu0 %v695_v58 }
 0x252   : > { %764 = vrot.lane.b32.xlu0 %v638_v35, %s1752_s23 }
 0x256   : > { %1015 = vrot.lane.b32.xlu0 %v638_v35, %s1753_s18 }
 0x2c5   : > { %v694_v59 = vpop.xlane.xlu0 %693 }
 0x2c6   : > { %v698_v60 = vsub.f32 %v689_v53, %v694_v59 }
 0x2c8   : > { %v700_v61 = vmul.f32 1.442695, %v698_v60 }
 0x2c9   : > { %v697_v62 = vpop.xlane.xlu0 %696 }
 0x2ca   : > { %1606 = vpow2.f32 %v700_v61  ;;  %v699_v63 = vsub.f32 %v690_v55, %v697_v62 }
 0x2cc   : > { %v702_v0 = vmul.f32 1.442695, %v699_v63 }
 0x2cd   : > { %v765_v9 = vpop.permute.xlu0 %764 }
 0x2ce   : > { %1608 = vpow2.f32 %v702_v0  ;;  %v770_v18 = vsel %vm639_vm1, %v765_v9, 0 }
 0x2d1   : > { %v1016_v16 = vpop.permute.xlu0 %1015 }
 0x2d2   : > { %v1021_v20 = vsel %vm639_vm1, %v1016_v16, 0 }
 0x2d4   : > { %v1607_v2 = vpop.eup %1606 }
 0x2d5   : > { %v704_v3 = vsel %vm691_vm2, %v1607_v2, 0.0 }
 0x2d6   : > { %705 = vadd.xlane.f32.xlu1 %v704_v3 }
 0x2d8   : > { %v1609_v4 = vpop.eup %1608 }
 0x2d9   : > { %v707_v5 = vsel %vm691_vm2, %v1609_v4, 0.0 }
 0x2da   : > { %708 = vadd.xlane.f32.xlu1 %v707_v5 }
 0x2eb   : > { %761 = vrot.lane.b32.xlu1 %v637_v34, %s1752_s23 }
 0x2ef   : > { %890 = vrot.lane.b32.xlu1 %v638_v35, %s1754_s25 }
 0x2f3   : > { %888 = vrot.lane.b32.xlu1 %v637_v34, %s1754_s25 }
 0x2f7   : > { %1013 = vrot.lane.b32.xlu1 %v637_v34, %s1753_s18 }
 0x363   : > { %v706_v6 = vpop.xlane.xlu1 %705 }
 0x364   : > { %1610 = vrcp.f32 %v706_v6 }
 0x367   : > { %v709_v7 = vpop.xlane.xlu1 %708 }
 0x368   : > { %1612 = vrcp.f32 %v709_v7 }
 0x36b   : > { %v762_v8 = vpop.permute.xlu1 %761 }
 0x36e   : > { %v1611_v11 = vpop.eup %1610 }
 0x36f   : > { %v891_v10 = vpop.permute.xlu1 %890  ;;  %v712_v14 = vmul.f32 %v1611_v11, %v1607_v2 }
 0x370   : > { %v896_v12 = vsel %vm639_vm1, %v891_v10, 0 }
 0x371   : > { %1499 = vmatpush3.bf16.xpose.msra.mxu0 %v896_v12 }
 0x372   : > { %v1613_v13 = vpop.eup %1612  ;;  %1510 = vmatprep.subr.bf16.mxu0 %v1750_v1 }
 0x373   : > { %v713_v15 = vmul.f32 %v1613_v13, %v1609_v4  ;;  %v889_v19 = vpop.permute.xlu1 %888 }
 0x375   : > { %v714_v17 = vpack.c.bf16 %v713_v15, %v712_v14 }
 0x377   : > { %1483 = vmatmul.mubr.msk.bf16.vlgmr.msra.gmra.mrb[8].mxu1 %vm691_vm2, %v714_v17  ;;  %v1014_v21 = vpop.permute.xlu1 %1013 }
 0x378   : > { %1487 = vmatpush3.bf16.xpose.msra.mxu1 %v770_v18  ;;  %1501 = vmatmul.mubr.msk.bf16.vlgmr.msra.gmra.mrb[4].mxu0 %vm639_vm1, %v889_v19 }
 0x379   : > { %1511 = vmatpush3.bf16.xpose.msra.mxu0 %v1021_v20  ;;  %1488 = vmatprep.mubr.msk.bf16.mxu1 %vm1751_vm0, %v1750_v1 }
 0x37a   : > { %1512 = vmatprep.mubr.msk.bf16.mxu0 %vm1751_vm0, %v1750_v1  ;;  %1492 = vmatprep.subr.bf16.mxu1 %v1750_v1 }
 0x37b   : > { %1522 = vmatprep.subr.bf16.mxu0 %v1750_v1 }
 0x37f   : > { %1489 = vmatmul.mubr.msk.bf16.vlgmr.msra.gmra.mrb[12].mxu1 %vm639_vm1, %v762_v8 }
 0x380   : > { %1513 = vmatmul.mubr.msk.bf16.vlgmr.msra.gmra.mrb[8].mxu0 %vm639_vm1, %v1014_v21  ;;  %1494 = vmatprep.mubr.msk.bf16.mxu1 %vm1751_vm0, %v1750_v1 }
 0x381   : > { %1538 = vmatprep.mubr.msk.bf16.mxu0 %vm1751_vm0, %v1750_v1 }
 0x44a   : > { %v2022_v22 = vpop.f32.mrb[8].mxu1 }
 0x44b   : > { %v1484_v23 = vpop.f32.mrb[9].mxu1  ;;  %v932_v24 = vpop.f32.mrb[4].mxu0 }
 0x44c   : > { %v2024_v25 = vpop.f32.mrb[10].mxu1  ;;  %v1502_v26 = vpop.f32.mrb[5].mxu0  ;;  %v939_v31 = vmul.f32 0.17677669, %v932_v24 }
 0x44d   : > { %v1485_v27 = vpop.f32.mrb[11].mxu1  ;;  %v935_v28 = vpop.f32.mrb[6].mxu0 }
 0x44e   : > { %v1503_v29 = vpop.f32.mrb[7].mxu0  ;;  %v940_v43 = vmul.f32 0.17677669, %v935_v28  ;;  %v941_v48 = vadd.f32 %v939_v31, %v1985_v46 }
 0x450   : > { %v943_v53 = vsel %vm691_vm2, %v941_v48, -inf  ;;  %v942_v54 = vadd.f32 %v940_v43, %v1990_v50 }
 0x452   : > { %v806_v30 = vpop.f32.mrb[12].mxu1  ;;  %v946_v58 = vsel %vm691_vm2, %v942_v54, -inf }
 0x453   : > { %v813_v32 = vmul.f32 0.17677669, %v806_v30  ;;  %v1490_v33 = vpop.f32.mrb[13].mxu1  ;;  %v1057_v34 = vpop.f32.mrb[8].mxu0 }
 0x454   : > { %v809_v35 = vpop.f32.mrb[14].mxu1  ;;  %v1514_v36 = vpop.f32.mrb[9].mxu0  ;;  %v1064_v52 = vmul.f32 0.17677669, %v1057_v34 }
 0x455   : > { %v814_v37 = vmul.f32 0.17677669, %v809_v35  ;;  %v1491_v38 = vpop.f32.mrb[15].mxu1  ;;  %v1060_v39 = vpop.f32.mrb[10].mxu0  ;;  %v815_v40 = vadd.f32 %v813_v32, %v1985_v46 }
 0x456   : > { %v1065_v41 = vmul.f32 0.17677669, %v1060_v39  ;;  %v1515_v42 = vpop.f32.mrb[11].mxu0  ;;  %v1066_v59 = vadd.f32 %v1064_v52, %v1985_v46 }
 0x457   : > { %v817_v45 = vsel %vm691_vm2, %v815_v40, -inf  ;;  %v816_v47 = vadd.f32 %v814_v37, %v1990_v50 }
 0x458   : > { %818 = vmax.xlane.f32.xlu0 %v817_v45  ;;  %v1067_v51 = vadd.f32 %v1065_v41, %v1990_v50  ;;  %v1068_v60 = vsel %vm691_vm2, %v1066_v59, -inf }
 0x459   : > { %v820_v49 = vsel %vm691_vm2, %v816_v47, -inf }
 0x45a   : > { %821 = vmax.xlane.f32.xlu1 %v820_v49  ;;  %v1071_v55 = vsel %vm691_vm2, %v1067_v51, -inf }
 0x45c   : > { %944 = vmax.xlane.f32.xlu0 %v943_v53 }
 0x45e   : > { %1072 = vmax.xlane.f32.xlu1 %v1071_v55  ;;  %v1172_v55 = vld [vmem:[#allocation6 + $0x8] sm:$0xff] }
 0x460   : > { %947 = vmax.xlane.f32.xlu0 %v946_v58  ;;  %v1173_v58 = vld [vmem:[#allocation6 + $0x10] sm:$0xff] }
 0x464   : > { %1069 = vmax.xlane.f32.xlu0 %v1068_v60  ;;  %v1174_v60 = vld [vmem:[#allocation6 + $0x18] sm:$0xff] }
 0x4e5   : > { %v819_v61 = vpop.xlane.xlu0 %818 }
 0x4e6   : > { %v823_v6 = vsub.f32 %v815_v40, %v819_v61  ;;  %v1188_v61 = vpack.c.bf16 %v1174_v60, %v1173_v58 }
 0x4e7   : > { %v822_v62 = vpop.xlane.xlu1 %821 }
 0x4e8   : > { %v824_v7 = vsub.f32 %v816_v47, %v822_v62  ;;  %v825_v11 = vmul.f32 1.442695, %v823_v6  ;;  %v1175_v62 = vld [vmem:[#allocation6 + $0x20] sm:$0xff] }
 0x4e9   : > { %v945_v63 = vpop.xlane.xlu0 %944 }
 0x4ea   : > { %v949_v0 = vsub.f32 %v941_v48, %v945_v63  ;;  %v827_v12 = vmul.f32 1.442695, %v824_v7  ;;  %v1176_v63 = vld [vmem:[#allocation6 + $0x28] sm:$0xff] }
 0x4eb   : > { %v1073_v2 = vpop.xlane.xlu1 %1072 }
 0x4ec   : > { %v951_v3 = vmul.f32 1.442695, %v949_v0  ;;  %v1075_v4 = vsub.f32 %v1067_v51, %v1073_v2  ;;  %v1189_v0 = vpack.c.bf16 %v1176_v63, %v1175_v62  ;;  %v1177_v2 = vld [vmem:[#allocation6 + $0x30] sm:$0xff] }
 0x4ed   : > { %v948_v50 = vpop.xlane.xlu0 %947 }
 0x4ee   : > { %1614 = vpow2.f32 %v951_v3  ;;  %v950_v5 = vsub.f32 %v942_v54, %v948_v50  ;;  %v1078_v8 = vmul.f32 1.442695, %v1075_v4  ;;  %v1171_v54 = vld [vmem:[#allocation6] sm:$0xff]  ;;  %v1178_v3 = vld [vmem:[#allocation6 + $0x38] sm:$0xff] }
 0x4ef   : > { %v1190_v4 = vpack.c.bf16 %v1178_v3, %v1177_v2  ;;  %v1179_v50 = vld [vmem:[#allocation6 + $0x40] sm:$0xff] }
 0x4f0   : > { %v953_v9 = vmul.f32 1.442695, %v950_v5  ;;  %v1180_v5 = vld [vmem:[#allocation6 + $0x48] sm:$0xff] }
 0x4f1   : > { %v1070_v10 = vpop.xlane.xlu0 %1069  ;;  %v1191_v6 = vpack.c.bf16 %v1180_v5, %v1179_v50 }
 0x4f2   : > { %1616 = vpow2.f32 %v953_v9  ;;  %v1074_v46 = vsub.f32 %v1066_v59, %v1070_v10  ;;  %v1187_v59 = vpack.c.bf16 %v1172_v55, %v1171_v54  ;;  %v1182_v9 = vld [vmem:[#allocation6 + $0x58] sm:$0xff] }
 0x4f3   : > { %1618 = vpow2.f32 %v1078_v8  ;;  %v1181_v8 = vld [vmem:[#allocation6 + $0x50] sm:$0xff] }
 0x4f4   : > { %v1076_v13 = vmul.f32 1.442695, %v1074_v46  ;;  %1523 = vmatpush3.bf16.msra.mxu0 %v1187_v59  ;;  %v1192_v46 = vpack.c.bf16 %v1182_v9, %v1181_v8  ;;  %v1414_v9 = vld [vmem:[%s2101_s10] ss:$0 sm:$0xff] }
 0x4f5   : > { %1524 = vmatprep.subr.bf16.mxu0 %v1750_v1 }
 0x4f6   : > { %1620 = vpow2.f32 %v1076_v13  ;;  %v1184_v13 = vld [vmem:[#allocation6 + $0x68] sm:$0xff] }
 0x4f7   : > { %1622 = vpow2.f32 %v825_v11 }
 0x4f8   : > { %v1615_v14 = vpop.eup %1614  ;;  %1624 = vpow2.f32 %v827_v12  ;;  %1525 = vmatpush3.bf16.msra.mxu0 %v1188_v61  ;;  %v1183_v12 = vld [vmem:[#allocation6 + $0x60] sm:$0xff] }
 0x4f9   : > { %v955_v15 = vsel %vm691_vm2, %v1615_v14, 0.0  ;;  %1526 = vmatprep.subr.bf16.mxu0 %v1750_v1 }
 0x4fa   : > { %956 = vadd.xlane.f32.xlu0 %v955_v15 }
 0x4fc   : > { %v1617_v16 = vpop.eup %1616  ;;  %1527 = vmatpush3.bf16.msra.mxu0 %v1189_v0 }
 0x4fd   : > { %v958_v17 = vsel %vm691_vm2, %v1617_v16, 0.0  ;;  %v1619_v18 = vpop.eup %1618  ;;  %1528 = vmatprep.subr.bf16.mxu0 %v1750_v1 }
 0x4fe   : > { %959 = vadd.xlane.f32.xlu1 %v958_v17  ;;  %v1083_v23 = vsel %vm691_vm2, %v1619_v18, 0.0 }
 0x500   : > { %v1621_v19 = vpop.eup %1620  ;;  %1529 = vmatpush3.bf16.msra.mxu0 %v1190_v4 }
 0x501   : > { %v1623_v20 = vpop.eup %1622  ;;  %v1080_v21 = vsel %vm691_vm2, %v1621_v19, 0.0  ;;  %1530 = vmatprep.subr.bf16.mxu0 %v1750_v1 }
 0x502   : > { %v1625_v24 = vpop.eup %1624  ;;  %1081 = vadd.xlane.f32.xlu0 %v1080_v21  ;;  %1084 = vadd.xlane.f32.xlu1 %v1083_v23  ;;  %v829_v26 = vsel %vm691_vm2, %v1623_v20, 0.0 }
 0x503   : > { %v832_v27 = vsel %vm691_vm2, %v1625_v24, 0.0 }
 0x504   : > { %1531 = vmatpush3.bf16.msra.mxu0 %v1191_v6 }
 0x505   : > { %1532 = vmatprep.subr.bf16.mxu0 %v1750_v1 }
 0x506   : > { %830 = vadd.xlane.f32.xlu0 %v829_v26  ;;  %833 = vadd.xlane.f32.xlu1 %v832_v27 }
 0x508   : > { %1533 = vmatpush3.bf16.msra.mxu0 %v1192_v46 }
 0x509   : > { %1534 = vmatprep.subr.bf16.mxu0 %v1750_v1 }
 0x517   : > { %966 = vrot.lane.b32.xlu1 %v1978_v44, %s1754_s25 }
 0x51b   : > { %1091 = vrot.lane.b32.xlu1 %v1978_v44, %s1753_s18 }
 0x51c   : > { %841 = vrot.lane.b32.xlu0 %v1978_v44, %s1752_s23 }
 0x587   : > { %v957_v28 = vpop.xlane.xlu0 %956 }
 0x58b   : > { %v960_v29 = vpop.xlane.xlu1 %959 }
 0x58f   : > { %v1082_v30 = vpop.xlane.xlu0 %1081  ;;  %v1085_v31 = vpop.xlane.xlu1 %1084 }
 0x593   : > { %v831_v32 = vpop.xlane.xlu0 %830  ;;  %v834_v33 = vpop.xlane.xlu1 %833 }
 0x594   : > { %1626 = vrcp.f32 %v831_v32 }
 0x595   : > { %1628 = vrcp.f32 %v834_v33 }
 0x596   : > { %1630 = vrcp.f32 %v960_v29 }
 0x597   : > { %v842_v34 = vpop.permute.xlu0 %841  ;;  %1632 = vrcp.f32 %v957_v28  ;;  %v967_v40 = vpop.permute.xlu1 %966 }
 0x598   : > { %1493 = vmatpush3.bf16.msra.mxu1 %v842_v34  ;;  %1634 = vrcp.f32 %v1082_v30 }
 0x599   : > { %1504 = vmatprep.subr.bf16.mxu1 %v1750_v1  ;;  %1636 = vrcp.f32 %v1085_v31 }
 0x59b   : > { %v1092_v49 = vpop.permute.xlu1 %1091 }
 0x59e   : > { %v1627_v35 = vpop.eup %1626 }
 0x59f   : > { %v1629_v36 = vpop.eup %1628  ;;  %v837_v37 = vmul.f32 %v1627_v35, %v1623_v20 }
 0x5a0   : > { %v838_v38 = vmul.f32 %v1629_v36, %v1625_v24  ;;  %v1631_v39 = vpop.eup %1630 }
 0x5a1   : > { %v1633_v41 = vpop.eup %1632  ;;  %v964_v42 = vmul.f32 %v1631_v39, %v1617_v16  ;;  %v1193_v16 = vpack.c.bf16 %v1184_v13, %v1183_v12 }
 0x5a2   : > { %v839_v44 = vpack.c.bf16 %v838_v38, %v837_v37  ;;  %v963_v43 = vmul.f32 %v1633_v41, %v1615_v14  ;;  %v1635_v45 = vpop.eup %1634 }
 0x5a3   : > { %v1637_v48 = vpop.eup %1636  ;;  %v1088_v51 = vmul.f32 %v1635_v45, %v1621_v19  ;;  %1535 = vmatpush3.bf16.msra.mxu0 %v1193_v16  ;;  %v1186_v19 = vld [vmem:[#allocation6 + $0x78] sm:$0xff] }
 0x5a4   : > { %1495 = vmatmul.mubr.msk.bf16.vlgmr.msra.gmra.mrb[16].mxu1 %vm691_vm2, %v839_v44  ;;  %v965_v47 = vpack.c.bf16 %v964_v42, %v963_v43  ;;  %v1089_v52 = vmul.f32 %v1637_v48, %v1619_v18  ;;  %1536 = vmatprep.subr.bf16.mxu0 %v1750_v1  ;;  %v1185_v18 = vld [vmem:[#allocation6 + $0x70] sm:$0xff]  ;;  %v1412_v48 = vld [vmem:[%s2099_s8] ss:$0 sm:$0xff] }
 0x5a5   : > { %1505 = vmatpush3.bf16.msra.mxu1 %v967_v40  ;;  %1506 = vmatprep.mubr.msk.bf16.mxu1 %vm1751_vm0, %v1750_v1  ;;  %v1194_v21 = vpack.c.bf16 %v1186_v19, %v1185_v18 }
 0x5a6   : > { %1516 = vmatprep.subr.bf16.mxu1 %v1750_v1  ;;  %v1090_v53 = vpack.c.bf16 %v1089_v52, %v1088_v51 }
 0x5a7   : > { %1537 = vmatpush3.bf16.msra.mxu0 %v1194_v21 }
 0x5ac   : > { %1507 = vmatmul.mubr.msk.bf16.vlgmr.msra.gmra.mrb[20].mxu1 %vm691_vm2, %v965_v47 }
 0x5ad   : > { %1517 = vmatpush3.bf16.msra.mxu1 %v1092_v49  ;;  %1518 = vmatprep.mubr.msk.bf16.mxu1 %vm1751_vm0, %v1750_v1 }
 0x5b4   : > { %1519 = vmatmul.mubr.msk.bf16.vlgmr.msra.gmra.mrb[24].mxu1 %vm691_vm2, %v1090_v53 }
 0x677   : > { %v881_v7 = vpop.f32.mrb[16].mxu1 }
 0x678   : > { %v1496_v10 = vpop.f32.mrb[17].mxu1 }
 0x679   : > { %v884_v11 = vpop.f32.mrb[18].mxu1 }
 0x67a   : > { %v1591_v14 = vpack.i.bf16 %v884_v11, %v881_v7  ;;  %v1497_v15 = vpop.f32.mrb[19].mxu1  ;;  %v1413_v7 = vld [vmem:[%s2100_s9] ss:$0 sm:$0xff] }
 0x67c   : > { %1592 = vrot.lane.b32.xlu1 %v1591_v14, %s1753_s18 }
 0x67f   : > { %v1006_v17 = vpop.f32.mrb[20].mxu1 }
 0x680   : > { %v1508_v20 = vpop.f32.mrb[21].mxu1 }
 0x681   : > { %v1009_v23 = vpop.f32.mrb[22].mxu1 }
 0x682   : > { %v1596_v24 = vpack.i.bf16 %v1009_v23, %v1006_v17  ;;  %v1509_v26 = vpop.f32.mrb[23].mxu1 }
 0x684   : > { %1597 = vrot.lane.b32.xlu0 %v1596_v24, %s1754_s25 }
 0x687   : > { %v1131_v27 = vpop.f32.mrb[24].mxu1 }
 0x688   : > { %v1520_v28 = vpop.f32.mrb[25].mxu1 }
 0x689   : > { %v1134_v29 = vpop.f32.mrb[26].mxu1 }
 0x68a   : > { %v1601_v30 = vpack.i.bf16 %v1134_v29, %v1131_v27  ;;  %v1521_v31 = vpop.f32.mrb[27].mxu1 }
 0x68c   : > { %1602 = vrot.lane.b32.xlu1 %v1601_v30, %s1752_s23 }
 0x6ee   : > { %v1593_v32 = vpop.permute.xlu1 %1592 }
 0x6ef   : > { %v1595_v1 = vunpack.i.h.bf16 %v1593_v32  ;;  %v1594_v34 = vunpack.i.l.bf16 %v1593_v32 }
 0x6f1   : > { %v1163_v38 = vsel %vm639_vm1, %v2024_v25, %v1595_v1  ;;  %v1162_v44 = vsel %vm639_vm1, %v2022_v22, %v1594_v34 }
 0x6f6   : > { %v1598_v33 = vpop.permute.xlu0 %1597 }
 0x6f7   : > { %v1600_v35 = vunpack.i.h.bf16 %v1598_v33  ;;  %v1599_v36 = vunpack.i.l.bf16 %v1598_v33 }
 0x6f9   : > { %v1166_v41 = vsel %vm1164_vm3, %v1163_v38, %v1600_v35  ;;  %v1165_v42 = vsel %vm1164_vm3, %v1162_v44, %v1599_v36 }
 0x6fe   : > { %v1603_v37 = vpop.permute.xlu1 %1602 }
 0x6ff   : > { %v1605_v39 = vunpack.i.h.bf16 %v1603_v37  ;;  %v1604_v40 = vunpack.i.l.bf16 %v1603_v37 }
 0x701   : > { %v1169_v43 = vsel %vm1167_vm4, %v1166_v41, %v1605_v39  ;;  %v1168_v45 = vsel %vm1167_vm4, %v1165_v42, %v1604_v40 }
 0x702   : > { %v1170_v47 = vpack.c.bf16 %v1169_v43, %v1168_v45 }
 0x704   : > { %1539 = vmatmul.mubr.bf16.vlgmr.msra.gmra.mrb[12].mxu0 %v1170_v47 }
 0x7d7   : > { %v1236_v49 = vpop.f32.mrb[12].mxu0 }
 0x7d8   : > { %v1237_v51 = vadd.f32 %v1412_v48, %v1236_v49  ;;  %v1540_v52 = vpop.f32.mrb[13].mxu0 }
 0x7d9   : > { %v1239_v53 = vpop.f32.mrb[14].mxu0 }
 0x7da   : > { %v1240_v25 = vadd.f32 %v1412_v48, %v1239_v53  ;;  %v1541_v54 = vpop.f32.mrb[15].mxu0  ;;  %v1243_v22 = vadd.f32 %v1237_v51, %v1946_v56 }
 0x7dc   : > { %1247 = vadd.xlane.f32.xlu0 %v1243_v22  ;;  %v1244_v55 = vadd.f32 %v1240_v25, %v1948_v57 }
 0x7de   : > { %1249 = vadd.xlane.f32.xlu1 %v1244_v55 }
 0x869   : > { %v1248_v58 = vpop.xlane.xlu0 %1247 }
 0x86a   : > { %v1252_v59 = vmul.f32 0.0078125, %v1248_v58 }
 0x86b   : > { %v1250_v60 = vpop.xlane.xlu1 %1249 }
 0x86c   : > { %v1254_v61 = vsub.f32 %v1243_v22, %v1252_v59  ;;  %v1253_v62 = vmul.f32 0.0078125, %v1250_v60 }
 0x86e   : > { %v1255_v63 = vsub.f32 %v1244_v55, %v1253_v62  ;;  %v1256_v0 = vmul.f32 %v1254_v61, %v1254_v61 }
 0x870   : > { %1258 = vadd.xlane.f32.xlu0 %v1256_v0  ;;  %v1257_v2 = vmul.f32 %v1255_v63, %v1255_v63 }
 0x874   : > { %1260 = vadd.xlane.f32.xlu0 %v1257_v2 }
 0x8fd   : > { %v1259_v3 = vpop.xlane.xlu0 %1258 }
 0x8fe   : > { %v1262_v4 = vmul.f32 0.0078125, %v1259_v3 }
 0x900   : > { %v1264_v50 = vadd.f32 1e-05, %v1262_v4 }
 0x901   : > { %v1261_v5 = vpop.xlane.xlu0 %1260 }
 0x902   : > { %1638 = vrsqrt.f32 %v1264_v50  ;;  %v1263_v56 = vmul.f32 0.0078125, %v1261_v5 }
 0x904   : > { %v1265_v6 = vadd.f32 1e-05, %v1263_v56 }
 0x906   : > { %1640 = vrsqrt.f32 %v1265_v6 }
 0x90c   : > { %v1639_v57 = vpop.eup %1638 }
 0x90d   : > { %v1268_v8 = vmul.f32 %v1639_v57, %v1254_v61 }
 0x90f   : > { %v1276_v10 = vmul.f32 %v1413_v7, %v1268_v8 }
 0x910   : > { %v1641_v46 = vpop.eup %1640 }
 0x911   : > { %v1284_v11 = vadd.f32 %v1414_v9, %v1276_v10  ;;  %v1269_v12 = vmul.f32 %v1641_v46, %v1255_v63 }
 0x913   : > { %1286 = vst [vmem:[%s450_s12] sm:$0xff] %v1284_v11  ;;  %v1277_v13 = vmul.f32 %v1413_v7, %v1269_v12 }
 0x915   : > { %v1285_v14 = vadd.f32 %v1414_v9, %v1277_v13 }
 0x917   : > { %1287 = vst [vmem:[%s450_s12 + $0x8] sm:$0xff] %v1285_v14 }
 0x918 PF: > { %s23_s17 = sadd.s32 1, %s1740_s17  }
 0x919   : > { %p20_p13 = scmp.ge.s32.totalorder %s23_s17, 4  }
 0x91b   :  { %22 = sbr.rel (!%p20_p13) target bundleno = 2 (0x2), region = 110 }
 0x922   :  { %1309 = vsyncpa [#allocation3], 1 }
 0x923   :  { %1311 = vsyncpa [#allocation3 + $0x1], 1 }
 0x924   :  { %1312 = vsyncpa [#allocation5], 1 }

// kernel: decoder_layer_forward.6
= control target key start
LH: loop header
LB: loop body
LE: loop exit
PB: predicated region body
PF: predicated region fallthrough
CT: control target
= control target key end

     0   :  { %v430_v3 = vmov 0   ;;  %s730_s2 = inlined_call_operand.vmem [shape: f32[128,128], index: 2, kind: input, shape index: {}]   ;;  %s731_s0 = inlined_call_operand.vmem [shape: f32[160,128], index: 0, kind: input, shape index: {}]   ;;  %s732_s1 = inlined_call_operand.vmem [shape: f32[160,1], index: 1, kind: input, shape index: {}]   ;;  %s733_s3 = inlined_call_operand.vmem [shape: f32[1,128], index: 3, kind: input, shape index: {}]   ;;  %s734_s4 = inlined_call_operand.vmem [shape: f32[160,128], index: 4, kind: output, shape index: {}]  }
   0x1   :  { %v48_v0 = vld [vmem:[%s730_s2] sm:$0xff]  ;;  %v49_v1 = vld [vmem:[%s730_s2 + $0x8] sm:$0xff]  ;;  %v50_v2 = vld [vmem:[%s730_s2 + $0x10] sm:$0xff]  ;;  %429 = vset.pattern.permute.xlu1 %v430_v3  ;;  %428 = vset.pattern.permute.xlu0 %v430_v3 }
   0x2   :  { %v64_v4 = vpack.c.bf16 %v49_v1, %v48_v0  ;;  %v51_v5 = vld [vmem:[%s730_s2 + $0x18] sm:$0xff]  ;;  %v52_v7 = vld [vmem:[%s730_s2 + $0x20] sm:$0xff]  ;;  %v53_v8 = vld [vmem:[%s730_s2 + $0x28] sm:$0xff] }
   0x3   :  { %v65_v6 = vpack.c.bf16 %v51_v5, %v50_v2  ;;  %v66_v9 = vpack.c.bf16 %v53_v8, %v52_v7  ;;  %v54_v10 = vld [vmem:[%s730_s2 + $0x30] sm:$0xff]  ;;  %v18_v11 = vld [vmem:[%s731_s0] sm:$0xff]  ;;  %v19_v12 = vld [vmem:[%s731_s0 + $0x8] sm:$0xff] }
   0x4   :  { %375 = vmatprep.subr.bf16.mxu0 %v64_v4  ;;  %411 = vmatprep.subr.bf16.mxu1 %v64_v4  ;;  %v55_v13 = vld [vmem:[%s730_s2 + $0x38] sm:$0xff]  ;;  %v38_v14 = vpack.c.bf16 %v19_v12, %v18_v11  ;;  %v30_v15 = vld [vmem:[%s731_s0 + $0x60] sm:$0xff]  ;;  %v31_v16 = vld [vmem:[%s731_s0 + $0x68] sm:$0xff] }
   0x5   :  { %376 = vmatpush3.bf16.msra.mxu0 %v64_v4  ;;  %419 = vmatpush3.bf16.msra.mxu1 %v64_v4  ;;  %v44_v17 = vpack.c.bf16 %v31_v16, %v30_v15  ;;  %v67_v18 = vpack.c.bf16 %v55_v13, %v54_v10  ;;  %v56_v19 = vld [vmem:[%s730_s2 + $0x40] sm:$0xff]  ;;  %v57_v20 = vld [vmem:[%s730_s2 + $0x48] sm:$0xff]  ;;  %v194_v21 = vld [vmem:[%s732_s1 + $0x10] sm:$0xff] }
   0x6   :  { %377 = vmatprep.subr.bf16.mxu0 %v65_v6  ;;  %412 = vmatprep.subr.bf16.mxu1 %v65_v6  ;;  %v192_v22 = vld [vmem:[%s732_s1] sm:$0xff]  ;;  %v68_v23 = vpack.c.bf16 %v57_v20, %v56_v19  ;;  %v58_v24 = vld [vmem:[%s730_s2 + $0x50] sm:$0xff]  ;;  %v59_v25 = vld [vmem:[%s730_s2 + $0x58] sm:$0xff] }
   0x7   :  { %391 = vmatprep.mubr.bf16.mxu0 %v38_v14  ;;  %403 = vmatprep.mubr.bf16.mxu1 %v44_v17  ;;  %v195_v26 = vld [vmem:[%s732_s1 + $0x18] sm:$0xff]  ;;  %v193_v27 = vld [vmem:[%s732_s1 + $0x8] sm:$0xff]  ;;  %v69_v28 = vpack.c.bf16 %v59_v25, %v58_v24  ;;  %v60_v29 = vld [vmem:[%s730_s2 + $0x60] sm:$0xff] }
   0x8   :  { %224 = vperm.xlu1 %429, %v194_v21   ;;  %214 = vperm.xlu0 %428, %v192_v22   ;;  %v61_v30 = vld [vmem:[%s730_s2 + $0x68] sm:$0xff]  ;;  %v196_v32 = vld [vmem:[%s732_s1 + $0x20] sm:$0xff]  ;;  %v62_v34 = vld [vmem:[%s730_s2 + $0x70] sm:$0xff] }
   0x9   :  { %378 = vmatpush3.bf16.msra.mxu0 %v65_v6  ;;  %420 = vmatpush3.bf16.msra.mxu1 %v65_v6  ;;  %v197_v31 = vld [vmem:[%s732_s1 + $0x28] sm:$0xff]  ;;  %v70_v33 = vpack.c.bf16 %v61_v30, %v60_v29  ;;  %v63_v35 = vld [vmem:[%s730_s2 + $0x78] sm:$0xff]  ;;  %v198_v37 = vld [vmem:[%s732_s1 + $0x30] sm:$0xff] }
   0xa   :  { %379 = vmatprep.subr.bf16.mxu0 %v66_v9  ;;  %413 = vmatprep.subr.bf16.mxu1 %v66_v9  ;;  %v199_v36 = vld [vmem:[%s732_s1 + $0x38] sm:$0xff]  ;;  %v71_v38 = vpack.c.bf16 %v63_v35, %v62_v34  ;;  %v20_v39 = vld [vmem:[%s731_s0 + $0x10] sm:$0xff]  ;;  %v201_v41 = vld [vmem:[%s732_s1 + $0x48] sm:$0xff] }
   0xb   :  { %v21_v40 = vld [vmem:[%s731_s0 + $0x18] sm:$0xff]  ;;  %v200_v42 = vld [vmem:[%s732_s1 + $0x40] sm:$0xff]  ;;  %v32_v43 = vld [vmem:[%s731_s0 + $0x70] sm:$0xff] }
   0xc   :  { %229 = vperm.xlu1 %429, %v195_v26   ;;  %219 = vperm.xlu0 %428, %v193_v27   ;;  %v33_v44 = vld [vmem:[%s731_s0 + $0x78] sm:$0xff]  ;;  %v22_v45 = vld [vmem:[%s731_s0 + $0x20] sm:$0xff]  ;;  %v23_v46 = vld [vmem:[%s731_s0 + $0x28] sm:$0xff]  ;;  %v39_v49 = vpack.c.bf16 %v21_v40, %v20_v39 }
   0xd   :  { %380 = vmatpush3.bf16.msra.mxu0 %v66_v9  ;;  %421 = vmatpush3.bf16.msra.mxu1 %v66_v9  ;;  %v34_v47 = vld [vmem:[%s731_s0 + $0x80] sm:$0xff]  ;;  %v35_v48 = vld [vmem:[%s731_s0 + $0x88] sm:$0xff]  ;;  %v45_v50 = vpack.c.bf16 %v33_v44, %v32_v43  ;;  %v203_v51 = vld [vmem:[%s732_s1 + $0x58] sm:$0xff]  ;;  %v40_v53 = vpack.c.bf16 %v23_v46, %v22_v45 }
   0xe   :  { %381 = vmatprep.subr.bf16.mxu0 %v67_v18  ;;  %414 = vmatprep.subr.bf16.mxu1 %v67_v18  ;;  %v202_v52 = vld [vmem:[%s732_s1 + $0x50] sm:$0xff]  ;;  %v46_v54 = vpack.c.bf16 %v35_v48, %v34_v47  ;;  %v205_v56 = vld [vmem:[%s732_s1 + $0x68] sm:$0xff]  ;;  %v204_v57 = vld [vmem:[%s732_s1 + $0x60] sm:$0xff] }
   0xf   :  { %v24_v55 = vld [vmem:[%s731_s0 + $0x30] sm:$0xff]  ;;  %v25_v58 = vld [vmem:[%s731_s0 + $0x38] sm:$0xff]  ;;  %v26_v61 = vld [vmem:[%s731_s0 + $0x40] sm:$0xff] }
  0x10   :  { %239 = vperm.xlu1 %429, %v197_v31   ;;  %234 = vperm.xlu0 %428, %v196_v32   ;;  %v36_v59 = vld [vmem:[%s731_s0 + $0x90] sm:$0xff]  ;;  %v37_v60 = vld [vmem:[%s731_s0 + $0x98] sm:$0xff]  ;;  %v27_v62 = vld [vmem:[%s731_s0 + $0x48] sm:$0xff]  ;;  %v41_v63 = vpack.c.bf16 %v25_v58, %v24_v55 }
  0x11   :  { %382 = vmatpush3.bf16.msra.mxu0 %v67_v18  ;;  %422 = vmatpush3.bf16.msra.mxu1 %v67_v18  ;;  %v47_v0 = vpack.c.bf16 %v37_v60, %v36_v59  ;;  %v207_v1 = vld [vmem:[%s732_s1 + $0x78] sm:$0xff]  ;;  %v206_v2 = vld [vmem:[%s732_s1 + $0x70] sm:$0xff]  ;;  %v42_v3 = vpack.c.bf16 %v27_v62, %v26_v61  ;;  %v209_v4 = vld [vmem:[%s732_s1 + $0x88] sm:$0xff] }
  0x12   :  { %383 = vmatprep.subr.bf16.mxu0 %v68_v23  ;;  %415 = vmatprep.subr.bf16.mxu1 %v68_v23  ;;  %v208_v5 = vld [vmem:[%s732_s1 + $0x80] sm:$0xff]  ;;  %v28_v6 = vld [vmem:[%s731_s0 + $0x50] sm:$0xff]  ;;  %v29_v7 = vld [vmem:[%s731_s0 + $0x58] sm:$0xff] }
  0x13   :  { %v43_v8 = vpack.c.bf16 %v29_v7, %v28_v6  ;;  %v211_v9 = vld [vmem:[%s732_s1 + $0x98] sm:$0xff]  ;;  %v210_v10 = vld [vmem:[%s732_s1 + $0x90] sm:$0xff]  ;;  %v641_v26 = vld [vmem:[%s733_s3] ss:$0 sm:$0xff] }
  0x14   :  { %249 = vperm.xlu1 %429, %v199_v36   ;;  %244 = vperm.xlu0 %428, %v198_v37  }
  0x15   :  { %384 = vmatpush3.bf16.msra.mxu0 %v68_v23  ;;  %423 = vmatpush3.bf16.msra.mxu1 %v68_v23 }
  0x16   :  { %385 = vmatprep.subr.bf16.mxu0 %v69_v28  ;;  %416 = vmatprep.subr.bf16.mxu1 %v69_v28 }
  0x18   :  { %259 = vperm.xlu1 %429, %v201_v41   ;;  %254 = vperm.xlu0 %428, %v200_v42  }
  0x19   :  { %386 = vmatpush3.bf16.msra.mxu0 %v69_v28  ;;  %424 = vmatpush3.bf16.msra.mxu1 %v69_v28 }
  0x1a   :  { %387 = vmatprep.subr.bf16.mxu0 %v70_v33  ;;  %417 = vmatprep.subr.bf16.mxu1 %v70_v33 }
  0x1c   :  { %269 = vperm.xlu1 %429, %v203_v51   ;;  %264 = vperm.xlu0 %428, %v202_v52  }
  0x1d   :  { %388 = vmatpush3.bf16.msra.mxu0 %v70_v33  ;;  %425 = vmatpush3.bf16.msra.mxu1 %v70_v33 }
  0x1e   :  { %389 = vmatprep.subr.bf16.mxu0 %v71_v38  ;;  %418 = vmatprep.subr.bf16.mxu1 %v71_v38 }
  0x20   :  { %279 = vperm.xlu1 %429, %v205_v56   ;;  %274 = vperm.xlu0 %428, %v204_v57  }
  0x21   :  { %390 = vmatpush3.bf16.msra.mxu0 %v71_v38  ;;  %426 = vmatpush3.bf16.msra.mxu1 %v71_v38 }
  0x24   :  { %392 = vmatmul.mubr.bf16.vlgmr.msra.gmra.mrb[0].mxu0 %v39_v49  ;;  %404 = vmatmul.mubr.bf16.vlgmr.msra.gmra.mrb[0].mxu1 %v45_v50 }
  0x25   :  { %395 = vmatprep.mubr.bf16.mxu0 %v40_v53  ;;  %407 = vmatprep.mubr.bf16.mxu1 %v46_v54 }
  0x26   :  { %289 = vperm.xlu1 %429, %v207_v1   ;;  %284 = vperm.xlu0 %428, %v206_v2  }
  0x2a   :  { %299 = vperm.xlu1 %429, %v209_v4   ;;  %294 = vperm.xlu0 %428, %v208_v5  }
  0x2c   :  { %396 = vmatmul.mubr.bf16.gmra.mrb[4].mxu0 %v41_v63  ;;  %408 = vmatmul.mubr.bf16.gmra.mrb[4].mxu1 %v47_v0 }
  0x2d   :  { %399 = vmatprep.mubr.bf16.mxu0 %v42_v3 }
  0x2e   :  { %309 = vperm.xlu1 %429, %v211_v9   ;;  %304 = vperm.xlu0 %428, %v210_v10  }
  0x34   :  { %400 = vmatmul.mubr.bf16.gmra.mrb[8].mxu0 %v43_v8 }
  0x87   :  { %v215_v11 = vpop.permute.xlu0 %214  ;;  %v225_v12 = vpop.permute.xlu1 %224 }
  0x8b   :  { %v220_v13 = vpop.permute.xlu0 %219  ;;  %v230_v14 = vpop.permute.xlu1 %229 }
  0x8f   :  { %v624_v15 = vpop.permute.xlu0 %234  ;;  %v626_v16 = vpop.permute.xlu1 %239 }
  0x93   :  { %v245_v17 = vpop.permute.xlu0 %244  ;;  %v628_v18 = vpop.permute.xlu1 %249 }
  0x97   :  { %v630_v19 = vpop.permute.xlu0 %254  ;;  %v632_v20 = vpop.permute.xlu1 %259 }
  0x9b   :  { %v634_v21 = vpop.permute.xlu0 %264  ;;  %v636_v22 = vpop.permute.xlu1 %269 }
  0x9f   :  { %v275_v23 = vpop.permute.xlu0 %274  ;;  %v280_v24 = vpop.permute.xlu1 %279 }
  0xa5   :  { %v285_v25 = vpop.permute.xlu0 %284  ;;  %v290_v27 = vpop.permute.xlu1 %289 }
  0xa9   :  { %v295_v28 = vpop.permute.xlu0 %294  ;;  %v300_v51 = vpop.permute.xlu1 %299 }
  0xad   :  { %v305_v54 = vpop.permute.xlu0 %304  ;;  %v310_v7 = vpop.permute.xlu1 %309 }
  0xf7   :  { %v393_v29 = vpop.f32.mrb[0].mxu0  ;;  %v405_v30 = vpop.f32.mrb[0].mxu1 }
  0xf8   :  { %v122_v31 = vadd.f32 %v393_v29, %v641_v26  ;;  %v170_v32 = vadd.f32 %v405_v30, %v641_v26  ;;  %v113_v33 = vpop.f32.mrb[1].mxu0  ;;  %v161_v34 = vpop.f32.mrb[1].mxu1 }
  0xf9   :  { %v114_v35 = vadd.f32 %v641_v26, %v113_v33  ;;  %v162_v36 = vadd.f32 %v641_v26, %v161_v34  ;;  %v394_v37 = vpop.f32.mrb[2].mxu0  ;;  %v406_v38 = vpop.f32.mrb[2].mxu1 }
  0xfa   :  { %v314_v39 = vmul.f32 %v225_v12, %v122_v31  ;;  %v326_v40 = vmul.f32 %v285_v25, %v170_v32  ;;  %v125_v41 = vadd.f32 %v394_v37, %v641_v26  ;;  %v173_v42 = vadd.f32 %v406_v38, %v641_v26  ;;  %v116_v43 = vpop.f32.mrb[3].mxu0  ;;  %v164_v44 = vpop.f32.mrb[3].mxu1 }
  0xfb   :  { %v312_v45 = vmul.f32 %v215_v11, %v114_v35  ;;  %v324_v46 = vmul.f32 %v275_v23, %v162_v36  ;;  %v117_v47 = vadd.f32 %v641_v26, %v116_v43  ;;  %v165_v48 = vadd.f32 %v641_v26, %v164_v44 }
  0xfc   :  { %334 = vst [vmem:[%s734_s4 + $0x10] sm:$0xff] %v314_v39  ;;  %346 = vst [vmem:[%s734_s4 + $0x70] sm:$0xff] %v326_v40  ;;  %v315_v49 = vmul.f32 %v230_v14, %v125_v41  ;;  %v327_v50 = vmul.f32 %v290_v27, %v173_v42 }
  0xfd   :  { %332 = vst [vmem:[%s734_s4] sm:$0xff] %v312_v45  ;;  %344 = vst [vmem:[%s734_s4 + $0x60] sm:$0xff] %v324_v46  ;;  %v313_v52 = vmul.f32 %v220_v13, %v117_v47  ;;  %v325_v53 = vmul.f32 %v280_v24, %v165_v48 }
  0xfe   :  { %335 = vst [vmem:[%s734_s4 + $0x18] sm:$0xff] %v315_v49  ;;  %347 = vst [vmem:[%s734_s4 + $0x78] sm:$0xff] %v327_v50 }
  0xff   :  { %333 = vst [vmem:[%s734_s4 + $0x8] sm:$0xff] %v313_v52  ;;  %345 = vst [vmem:[%s734_s4 + $0x68] sm:$0xff] %v325_v53  ;;  %v397_v55 = vpop.f32.mrb[4].mxu0  ;;  %v409_v56 = vpop.f32.mrb[4].mxu1 }
 0x100   :  { %v138_v57 = vadd.f32 %v397_v55, %v641_v26  ;;  %v186_v58 = vadd.f32 %v409_v56, %v641_v26  ;;  %v129_v59 = vpop.f32.mrb[5].mxu0  ;;  %v177_v60 = vpop.f32.mrb[5].mxu1 }
 0x101   :  { %v130_v61 = vadd.f32 %v641_v26, %v129_v59  ;;  %v178_v62 = vadd.f32 %v641_v26, %v177_v60  ;;  %v398_v63 = vpop.f32.mrb[6].mxu0  ;;  %v410_v0 = vpop.f32.mrb[6].mxu1 }
 0x102   :  { %v318_v1 = vmul.f32 %v245_v17, %v138_v57  ;;  %v330_v2 = vmul.f32 %v305_v54, %v186_v58  ;;  %v141_v3 = vadd.f32 %v398_v63, %v641_v26  ;;  %v189_v4 = vadd.f32 %v410_v0, %v641_v26  ;;  %v132_v5 = vpop.f32.mrb[7].mxu0  ;;  %v180_v6 = vpop.f32.mrb[7].mxu1 }
 0x103   :  { %v316_v8 = vmul.f32 %v624_v15, %v130_v61  ;;  %v328_v9 = vmul.f32 %v295_v28, %v178_v62  ;;  %v133_v10 = vadd.f32 %v641_v26, %v132_v5  ;;  %v181_v11 = vadd.f32 %v641_v26, %v180_v6 }
 0x104   :  { %338 = vst [vmem:[%s734_s4 + $0x30] sm:$0xff] %v318_v1  ;;  %350 = vst [vmem:[%s734_s4 + $0x90] sm:$0xff] %v330_v2  ;;  %v319_v12 = vmul.f32 %v628_v18, %v141_v3  ;;  %v331_v13 = vmul.f32 %v310_v7, %v189_v4 }
 0x105   :  { %336 = vst [vmem:[%s734_s4 + $0x20] sm:$0xff] %v316_v8  ;;  %348 = vst [vmem:[%s734_s4 + $0x80] sm:$0xff] %v328_v9  ;;  %v317_v14 = vmul.f32 %v626_v16, %v133_v10  ;;  %v329_v15 = vmul.f32 %v300_v51, %v181_v11 }
 0x106   :  { %339 = vst [vmem:[%s734_s4 + $0x38] sm:$0xff] %v319_v12  ;;  %351 = vst [vmem:[%s734_s4 + $0x98] sm:$0xff] %v331_v13 }
 0x107   :  { %337 = vst [vmem:[%s734_s4 + $0x28] sm:$0xff] %v317_v14  ;;  %349 = vst [vmem:[%s734_s4 + $0x88] sm:$0xff] %v329_v15  ;;  %v401_v17 = vpop.f32.mrb[8].mxu0 }
 0x108   :  { %v154_v16 = vadd.f32 %v401_v17, %v641_v26  ;;  %v145_v18 = vpop.f32.mrb[9].mxu0 }
 0x109   :  { %v146_v23 = vadd.f32 %v641_v26, %v145_v18  ;;  %v402_v24 = vpop.f32.mrb[10].mxu0 }
 0x10a   :  { %v322_v25 = vmul.f32 %v634_v21, %v154_v16  ;;  %v157_v27 = vadd.f32 %v402_v24, %v641_v26  ;;  %v148_v28 = vpop.f32.mrb[11].mxu0 }
 0x10b   :  { %v320_v29 = vmul.f32 %v630_v19, %v146_v23  ;;  %v149_v30 = vadd.f32 %v641_v26, %v148_v28 }
 0x10c   :  { %342 = vst [vmem:[%s734_s4 + $0x50] sm:$0xff] %v322_v25  ;;  %v323_v31 = vmul.f32 %v636_v22, %v157_v27 }
 0x10d   :  { %340 = vst [vmem:[%s734_s4 + $0x40] sm:$0xff] %v320_v29  ;;  %v321_v32 = vmul.f32 %v632_v20, %v149_v30 }
 0x10e   :  { %343 = vst [vmem:[%s734_s4 + $0x58] sm:$0xff] %v323_v31 }
 0x10f   :  { %341 = vst [vmem:[%s734_s4 + $0x48] sm:$0xff] %v321_v32 }

// kernel: decoder_layer_forward.8
= control target key start
LH: loop header
LB: loop body
LE: loop exit
PB: predicated region body
PF: predicated region fallthrough
CT: control target
= control target key end

     0   :  { %s362_s2 = inlined_call_operand.vmem [shape: f32[128,128], index: 2, kind: input, shape index: {}]   ;;  %s363_s0 = inlined_call_operand.vmem [shape: f32[32,128], index: 0, kind: input, shape index: {}]   ;;  %s364_s3 = inlined_call_operand.vmem [shape: f32[1,128], index: 3, kind: input, shape index: {}]   ;;  %s365_s1 = inlined_call_operand.vmem [shape: f32[32,128], index: 1, kind: input, shape index: {}]   ;;  %s366_s4 = inlined_call_operand.vmem [shape: f32[1,128], index: 4, kind: input, shape index: {}]   ;;  %s367_s5 = inlined_call_operand.vmem [shape: f32[1,128], index: 5, kind: input, shape index: {}]   ;;  %s368_s6 = inlined_call_operand.vmem [shape: f32[32,128], index: 6, kind: output, shape index: {}]  }
   0x1   :  { %v30_v0 = vld [vmem:[%s362_s2] sm:$0xff]  ;;  %v31_v1 = vld [vmem:[%s362_s2 + $0x8] sm:$0xff]  ;;  %v32_v2 = vld [vmem:[%s362_s2 + $0x10] sm:$0xff] }
   0x2   :  { %v46_v3 = vpack.c.bf16 %v31_v1, %v30_v0  ;;  %v33_v4 = vld [vmem:[%s362_s2 + $0x18] sm:$0xff]  ;;  %v34_v6 = vld [vmem:[%s362_s2 + $0x20] sm:$0xff]  ;;  %v35_v7 = vld [vmem:[%s362_s2 + $0x28] sm:$0xff] }
   0x3   :  { %v47_v5 = vpack.c.bf16 %v33_v4, %v32_v2  ;;  %v48_v8 = vpack.c.bf16 %v35_v7, %v34_v6  ;;  %v24_v9 = vld [vmem:[%s363_s0] sm:$0xff]  ;;  %v25_v10 = vld [vmem:[%s363_s0 + $0x8] sm:$0xff]  ;;  %v36_v11 = vld [vmem:[%s362_s2 + $0x30] sm:$0xff] }
   0x4   :  { %206 = vmatprep.subr.bf16.mxu0 %v46_v3  ;;  %v37_v12 = vld [vmem:[%s362_s2 + $0x38] sm:$0xff]  ;;  %v28_v13 = vpack.c.bf16 %v25_v10, %v24_v9  ;;  %v38_v15 = vld [vmem:[%s362_s2 + $0x40] sm:$0xff]  ;;  %v39_v16 = vld [vmem:[%s362_s2 + $0x48] sm:$0xff] }
   0x5   :  { %207 = vmatpush3.bf16.msra.mxu0 %v46_v3  ;;  %v49_v14 = vpack.c.bf16 %v37_v12, %v36_v11  ;;  %v50_v17 = vpack.c.bf16 %v39_v16, %v38_v15  ;;  %v40_v18 = vld [vmem:[%s362_s2 + $0x50] sm:$0xff]  ;;  %v41_v19 = vld [vmem:[%s362_s2 + $0x58] sm:$0xff]  ;;  %v42_v21 = vld [vmem:[%s362_s2 + $0x60] sm:$0xff] }
   0x6   :  { %208 = vmatprep.subr.bf16.mxu0 %v47_v5  ;;  %222 = vmatprep.mubr.bf16.mxu0 %v28_v13  ;;  %v51_v20 = vpack.c.bf16 %v41_v19, %v40_v18  ;;  %v43_v22 = vld [vmem:[%s362_s2 + $0x68] sm:$0xff]  ;;  %v44_v24 = vld [vmem:[%s362_s2 + $0x70] sm:$0xff]  ;;  %v45_v25 = vld [vmem:[%s362_s2 + $0x78] sm:$0xff] }
   0x7   :  { %v52_v23 = vpack.c.bf16 %v43_v22, %v42_v21  ;;  %v53_v26 = vpack.c.bf16 %v45_v25, %v44_v24  ;;  %v26_v27 = vld [vmem:[%s363_s0 + $0x10] sm:$0xff]  ;;  %v27_v28 = vld [vmem:[%s363_s0 + $0x18] sm:$0xff]  ;;  %v193_v30 = vld [vmem:[%s364_s3] ss:$0 sm:$0xff] }
   0x8   :  { %v29_v29 = vpack.c.bf16 %v27_v28, %v26_v27  ;;  %v112_v32 = vld [vmem:[%s365_s1 + $0x10] sm:$0xff]  ;;  %v110_v35 = vld [vmem:[%s365_s1] sm:$0xff]  ;;  %v113_v43 = vld [vmem:[%s365_s1 + $0x18] sm:$0xff] }
   0x9   :  { %209 = vmatpush3.bf16.msra.mxu0 %v47_v5  ;;  %v111_v44 = vld [vmem:[%s365_s1 + $0x8] sm:$0xff]  ;;  %v194_v12 = vld [vmem:[%s366_s4] ss:$0 sm:$0xff] }
   0xa   :  { %210 = vmatprep.subr.bf16.mxu0 %v48_v8 }
   0xd   :  { %211 = vmatpush3.bf16.msra.mxu0 %v48_v8 }
   0xe   :  { %212 = vmatprep.subr.bf16.mxu0 %v49_v14 }
  0x11   :  { %213 = vmatpush3.bf16.msra.mxu0 %v49_v14  ;;  %v195_v14 = vld [vmem:[%s367_s5] ss:$0 sm:$0xff] }
  0x12   :  { %214 = vmatprep.subr.bf16.mxu0 %v50_v17 }
  0x15   :  { %215 = vmatpush3.bf16.msra.mxu0 %v50_v17 }
  0x16   :  { %216 = vmatprep.subr.bf16.mxu0 %v51_v20 }
  0x19   :  { %217 = vmatpush3.bf16.msra.mxu0 %v51_v20 }
  0x1a   :  { %218 = vmatprep.subr.bf16.mxu0 %v52_v23 }
  0x1d   :  { %219 = vmatpush3.bf16.msra.mxu0 %v52_v23 }
  0x1e   :  { %220 = vmatprep.subr.bf16.mxu0 %v53_v26 }
  0x21   :  { %221 = vmatpush3.bf16.msra.mxu0 %v53_v26 }
  0x24   :  { %223 = vmatmul.mubr.bf16.vlgmr.msra.gmra.mrb[0].mxu0 %v29_v29 }
  0xf7   :  { %v224_v31 = vpop.f32.mrb[0].mxu0 }
  0xf8   :  { %v104_v33 = vadd.f32 %v224_v31, %v193_v30  ;;  %v95_v34 = vpop.f32.mrb[1].mxu0 }
  0xf9   :  { %v96_v36 = vadd.f32 %v193_v30, %v95_v34  ;;  %v225_v37 = vpop.f32.mrb[2].mxu0 }
  0xfa   :  { %v107_v38 = vadd.f32 %v225_v37, %v193_v30  ;;  %v98_v39 = vpop.f32.mrb[3].mxu0  ;;  %v116_v40 = vadd.f32 %v112_v32, %v104_v33 }
  0xfb   :  { %v99_v41 = vadd.f32 %v193_v30, %v98_v39  ;;  %v114_v42 = vadd.f32 %v110_v35, %v96_v36 }
  0xfc   :  { %124 = vadd.xlane.f32.xlu1 %v116_v40  ;;  %v117_v45 = vadd.f32 %v113_v43, %v107_v38 }
  0xfd   :  { %120 = vadd.xlane.f32.xlu0 %v114_v42  ;;  %v115_v46 = vadd.f32 %v111_v44, %v99_v41 }
 0x100   :  { %126 = vadd.xlane.f32.xlu1 %v117_v45 }
 0x101   :  { %122 = vadd.xlane.f32.xlu0 %v115_v46 }
 0x189   :  { %v125_v47 = vpop.xlane.xlu1 %124 }
 0x18a   :  { %v121_v48 = vpop.xlane.xlu0 %120  ;;  %v131_v49 = vmul.f32 0.0078125, %v125_v47 }
 0x18b   :  { %v129_v50 = vmul.f32 0.0078125, %v121_v48 }
 0x18c   :  { %v135_v54 = vsub.f32 %v116_v40, %v131_v49 }
 0x18d   :  { %v133_v51 = vsub.f32 %v114_v42, %v129_v50  ;;  %v127_v52 = vpop.xlane.xlu1 %126 }
 0x18e   :  { %v123_v53 = vpop.xlane.xlu0 %122  ;;  %v132_v55 = vmul.f32 0.0078125, %v127_v52  ;;  %v139_v60 = vmul.f32 %v135_v54, %v135_v54 }
 0x18f   :  { %v130_v56 = vmul.f32 0.0078125, %v123_v53  ;;  %v137_v57 = vmul.f32 %v133_v51, %v133_v51 }
 0x190   :  { %v136_v59 = vsub.f32 %v117_v45, %v132_v55 }
 0x191   :  { %v134_v58 = vsub.f32 %v115_v46, %v130_v56  ;;  %141 = vadd.xlane.f32.xlu0 %v137_v57 }
 0x192   :  { %v140_v62 = vmul.f32 %v136_v59, %v136_v59 }
 0x193   :  { %v138_v61 = vmul.f32 %v134_v58, %v134_v58 }
 0x195   :  { %145 = vadd.xlane.f32.xlu0 %v139_v60  ;;  %143 = vadd.xlane.f32.xlu1 %v138_v61 }
 0x199   :  { %147 = vadd.xlane.f32.xlu1 %v140_v62 }
 0x21e   :  { %v142_v63 = vpop.xlane.xlu0 %141 }
 0x21f   :  { %v149_v0 = vmul.f32 0.0078125, %v142_v63 }
 0x221   :  { %v153_v1 = vadd.f32 1e-05, %v149_v0 }
 0x222   :  { %v144_v2 = vpop.xlane.xlu1 %143  ;;  %v146_v3 = vpop.xlane.xlu0 %145 }
 0x223   :  { %226 = vrsqrt.f32 %v153_v1  ;;  %v150_v4 = vmul.f32 0.0078125, %v144_v2  ;;  %v151_v5 = vmul.f32 0.0078125, %v146_v3 }
 0x225   :  { %v154_v6 = vadd.f32 1e-05, %v150_v4  ;;  %v155_v7 = vadd.f32 1e-05, %v151_v5 }
 0x226   :  { %v148_v8 = vpop.xlane.xlu1 %147 }
 0x227   :  { %228 = vrsqrt.f32 %v154_v6  ;;  %v152_v9 = vmul.f32 0.0078125, %v148_v8 }
 0x228   :  { %230 = vrsqrt.f32 %v155_v7 }
 0x229   :  { %v156_v10 = vadd.f32 1e-05, %v152_v9 }
 0x22b   :  { %232 = vrsqrt.f32 %v156_v10 }
 0x22d   :  { %v227_v11 = vpop.eup %226 }
 0x22e   :  { %v161_v13 = vmul.f32 %v227_v11, %v133_v51 }
 0x230   :  { %v171_v15 = vmul.f32 %v194_v12, %v161_v13 }
 0x231   :  { %v229_v16 = vpop.eup %228 }
 0x232   :  { %v231_v17 = vpop.eup %230  ;;  %v181_v18 = vadd.f32 %v195_v14, %v171_v15  ;;  %v162_v19 = vmul.f32 %v229_v16, %v134_v58 }
 0x233   :  { %v163_v20 = vmul.f32 %v231_v17, %v135_v54 }
 0x234   :  { %185 = vst [vmem:[%s368_s6] sm:$0xff] %v181_v18  ;;  %v172_v21 = vmul.f32 %v194_v12, %v162_v19 }
 0x235   :  { %v233_v22 = vpop.eup %232  ;;  %v173_v23 = vmul.f32 %v194_v12, %v163_v20 }
 0x236   :  { %v182_v24 = vadd.f32 %v195_v14, %v172_v21  ;;  %v164_v25 = vmul.f32 %v233_v22, %v136_v59 }
 0x237   :  { %v183_v26 = vadd.f32 %v195_v14, %v173_v23 }
 0x238   :  { %186 = vst [vmem:[%s368_s6 + $0x8] sm:$0xff] %v182_v24  ;;  %v174_v27 = vmul.f32 %v194_v12, %v164_v25 }
 0x239   :  { %187 = vst [vmem:[%s368_s6 + $0x10] sm:$0xff] %v183_v26 }
 0x23a   :  { %v184_v28 = vadd.f32 %v195_v14, %v174_v27 }
 0x23c   :  { %188 = vst [vmem:[%s368_s6 + $0x18] sm:$0xff] %v184_v28 }

// kernel: decoder_layer_forward.9
= control target key start
LH: loop header
LB: loop body
LE: loop exit
PB: predicated region body
PF: predicated region fallthrough
CT: control target
= control target key end

     0   :  { %v421_v7 = vmov 0   ;;  %s711_s0 = inlined_call_operand.vmem [shape: f32[32,128], index: 0, kind: input, shape index: {}]   ;;  %s712_s1 = inlined_call_operand.vmem [shape: f32[128,256], index: 1, kind: input, shape index: {}]   ;;  %s713_s2 = inlined_call_operand.vmem [shape: f32[1,256], index: 2, kind: input, shape index: {}]   ;;  %s714_s3 = inlined_call_operand.vmem [shape: f32[256,128], index: 3, kind: input, shape index: {}]   ;;  %s715_s4 = inlined_call_operand.vmem [shape: f32[1,128], index: 4, kind: input, shape index: {}]   ;;  %s716_s5 = inlined_call_operand.vmem [shape: f32[1,128], index: 5, kind: input, shape index: {}]   ;;  %s717_s6 = inlined_call_operand.vmem [shape: f32[1,128], index: 6, kind: input, shape index: {}]   ;;  %s718_s7 = inlined_call_operand.hbm [shape: f32[32,128], index: 7, kind: output, shape index: {}]  }
   0x1   :  { %v35_v0 = vld [vmem:[%s712_s1 + $0x8] sm:$0xff]  ;;  %v37_v1 = vld [vmem:[%s712_s1 + $0x18] sm:$0xff]  ;;  %v34_v2 = vld [vmem:[%s712_s1] sm:$0xff]  ;;  %126 = vmatprep.mubr.bf16.mxu0 %v421_v7 }
   0x2   :  { %v67_v3 = vpack.c.bf16 %v37_v1, %v35_v0  ;;  %v36_v4 = vld [vmem:[%s712_s1 + $0x10] sm:$0xff]  ;;  %v39_v5 = vld [vmem:[%s712_s1 + $0x28] sm:$0xff]  ;;  %v41_v6 = vld [vmem:[%s712_s1 + $0x38] sm:$0xff] }
   0x3   :  { %v66_v8 = vpack.c.bf16 %v36_v4, %v34_v2  ;;  %v69_v9 = vpack.c.bf16 %v41_v6, %v39_v5  ;;  %v38_v10 = vld [vmem:[%s712_s1 + $0x20] sm:$0xff]  ;;  %v40_v11 = vld [vmem:[%s712_s1 + $0x30] sm:$0xff]  ;;  %v43_v12 = vld [vmem:[%s712_s1 + $0x48] sm:$0xff] }
   0x4   :  { %94 = vmatprep.subr.bf16.mxu0 %v67_v3  ;;  %v45_v13 = vld [vmem:[%s712_s1 + $0x58] sm:$0xff]  ;;  %v68_v14 = vpack.c.bf16 %v40_v11, %v38_v10  ;;  %v42_v16 = vld [vmem:[%s712_s1 + $0x40] sm:$0xff]  ;;  %v44_v17 = vld [vmem:[%s712_s1 + $0x50] sm:$0xff] }
   0x5   :  { %95 = vmatpush1.bf16.msra.mxu0 %v66_v8  ;;  %v71_v15 = vpack.c.bf16 %v45_v13, %v43_v12  ;;  %v47_v18 = vld [vmem:[%s712_s1 + $0x68] sm:$0xff]  ;;  %v49_v19 = vld [vmem:[%s712_s1 + $0x78] sm:$0xff]  ;;  %v70_v20 = vpack.c.bf16 %v44_v17, %v42_v16  ;;  %v46_v22 = vld [vmem:[%s712_s1 + $0x60] sm:$0xff] }
   0x6   :  { %96 = vmatprep.subr.bf16.mxu0 %v69_v9  ;;  %v73_v21 = vpack.c.bf16 %v49_v19, %v47_v18  ;;  %v48_v23 = vld [vmem:[%s712_s1 + $0x70] sm:$0xff]  ;;  %v51_v24 = vld [vmem:[%s712_s1 + $0x88] sm:$0xff]  ;;  %v53_v25 = vld [vmem:[%s712_s1 + $0x98] sm:$0xff] }
   0x7   :  { %v50_v26 = vld [vmem:[%s712_s1 + $0x80] sm:$0xff]  ;;  %v52_v27 = vld [vmem:[%s712_s1 + $0x90] sm:$0xff]  ;;  %v72_v28 = vpack.c.bf16 %v48_v23, %v46_v22  ;;  %v55_v29 = vld [vmem:[%s712_s1 + $0xa8] sm:$0xff]  ;;  %v75_v34 = vpack.c.bf16 %v53_v25, %v51_v24 }
   0x8   :  { %v57_v30 = vld [vmem:[%s712_s1 + $0xb8] sm:$0xff]  ;;  %v175_v31 = vld [vmem:[%s714_s3 + $0x80] sm:$0xff]  ;;  %v176_v32 = vld [vmem:[%s714_s3 + $0x88] sm:$0xff]  ;;  %v74_v45 = vpack.c.bf16 %v52_v27, %v50_v26 }
   0x9   :  { %97 = vmatpush1.bf16.msra.mxu0 %v68_v14  ;;  %v159_v33 = vld [vmem:[%s714_s3] sm:$0xff]  ;;  %v199_v35 = vpack.c.bf16 %v176_v32, %v175_v31  ;;  %v160_v36 = vld [vmem:[%s714_s3 + $0x8] sm:$0xff]  ;;  %v177_v37 = vld [vmem:[%s714_s3 + $0x90] sm:$0xff]  ;;  %v77_v49 = vpack.c.bf16 %v57_v30, %v55_v29 }
   0xa   :  { %98 = vmatprep.subr.bf16.mxu0 %v71_v15  ;;  %v178_v38 = vld [vmem:[%s714_s3 + $0x98] sm:$0xff]  ;;  %v191_v39 = vpack.c.bf16 %v160_v36, %v159_v33  ;;  %v161_v41 = vld [vmem:[%s714_s3 + $0x10] sm:$0xff]  ;;  %v179_v43 = vld [vmem:[%s714_s3 + $0xa0] sm:$0xff] }
   0xb   :  { %v200_v40 = vpack.c.bf16 %v178_v38, %v177_v37  ;;  %v162_v42 = vld [vmem:[%s714_s3 + $0x18] sm:$0xff]  ;;  %357 = vmatprep.subr.bf16.mxu1 %v199_v35  ;;  %v180_v44 = vld [vmem:[%s714_s3 + $0xa8] sm:$0xff]  ;;  %v54_v46 = vld [vmem:[%s712_s1 + $0xa0] sm:$0xff] }
   0xc   :  { %v56_v47 = vld [vmem:[%s712_s1 + $0xb0] sm:$0xff]  ;;  %358 = vmatpush3.bf16.msra.mxu1 %v191_v39  ;;  %v192_v48 = vpack.c.bf16 %v162_v42, %v161_v41  ;;  %v59_v50 = vld [vmem:[%s712_s1 + $0xc8] sm:$0xff]  ;;  %v201_v51 = vpack.c.bf16 %v180_v44, %v179_v43  ;;  %v163_v52 = vld [vmem:[%s714_s3 + $0x20] sm:$0xff] }
   0xd   :  { %99 = vmatpush1.bf16.msra.mxu0 %v70_v20  ;;  %359 = vmatprep.subr.bf16.mxu1 %v200_v40  ;;  %v164_v53 = vld [vmem:[%s714_s3 + $0x28] sm:$0xff]  ;;  %v61_v54 = vld [vmem:[%s712_s1 + $0xd8] sm:$0xff]  ;;  %v181_v55 = vld [vmem:[%s714_s3 + $0xb0] sm:$0xff] }
   0xe   :  { %100 = vmatprep.subr.bf16.mxu0 %v73_v21  ;;  %v182_v56 = vld [vmem:[%s714_s3 + $0xb8] sm:$0xff] }
  0x11   :  { %101 = vmatpush1.bf16.msra.mxu0 %v72_v28 }
  0x12   :  { %102 = vmatprep.subr.bf16.mxu0 %v75_v34 }
  0x13   :  { %12 = vsyncpa [#allocation3], 0  ;;  %v76_v57 = vpack.c.bf16 %v56_v47, %v54_v46  ;;  %v58_v58 = vld [vmem:[%s712_s1 + $0xc0] sm:$0xff]  ;;  %v60_v59 = vld [vmem:[%s712_s1 + $0xd0] sm:$0xff]  ;;  %360 = vmatpush3.bf16.msra.mxu1 %v192_v48  ;;  %v193_v60 = vpack.c.bf16 %v164_v53, %v163_v52  ;;  %v79_v61 = vpack.c.bf16 %v61_v54, %v59_v50  ;;  %v202_v63 = vpack.c.bf16 %v182_v56, %v181_v55 }
  0x14   :  { %v63_v62 = vld [vmem:[%s712_s1 + $0xe8] sm:$0xff]  ;;  %361 = vmatprep.subr.bf16.mxu1 %v201_v51  ;;  %v165_v0 = vld [vmem:[%s714_s3 + $0x30] sm:$0xff]  ;;  %v166_v1 = vld [vmem:[%s714_s3 + $0x38] sm:$0xff]  ;;  %v78_v5 = vpack.c.bf16 %v60_v59, %v58_v58  ;;  %v84_v39 = vlaneseq }
  0x15   :  { %103 = vmatpush1.bf16.msra.mxu0 %v74_v45  ;;  %v65_v2 = vld [vmem:[%s712_s1 + $0xf8] sm:$0xff]  ;;  %v183_v3 = vld [vmem:[%s714_s3 + $0xc0] sm:$0xff]  ;;  %v184_v4 = vld [vmem:[%s714_s3 + $0xc8] sm:$0xff]  ;;  %v194_v8 = vpack.c.bf16 %v166_v1, %v165_v0 }
  0x16   :  { %104 = vmatprep.subr.bf16.mxu0 %v77_v49  ;;  %v62_v6 = vld [vmem:[%s712_s1 + $0xe0] sm:$0xff]  ;;  %v81_v9 = vpack.c.bf16 %v65_v2, %v63_v62  ;;  %v64_v10 = vld [vmem:[%s712_s1 + $0xf0] sm:$0xff]  ;;  %v203_v11 = vpack.c.bf16 %v184_v4, %v183_v3  ;;  %v168_v13 = vld [vmem:[%s714_s3 + $0x48] sm:$0xff]  ;;  %v85_v40 = vshrl.u32 %v84_v39, 7 }
  0x17   :  { %362 = vmatpush3.bf16.msra.mxu1 %v193_v60  ;;  %v167_v12 = vld [vmem:[%s714_s3 + $0x40] sm:$0xff]  ;;  %v185_v14 = vld [vmem:[%s714_s3 + $0xd0] sm:$0xff]  ;;  %v186_v15 = vld [vmem:[%s714_s3 + $0xd8] sm:$0xff]  ;;  %v80_v16 = vpack.c.bf16 %v64_v10, %v62_v6 }
  0x18   :  { %363 = vmatprep.subr.bf16.mxu1 %v202_v63  ;;  %v631_v17 = vld [vmem:[%s711_s0] sm:$0xff]  ;;  %v636_v18 = vld [vmem:[%s711_s0 + $0x8] sm:$0xff]  ;;  %v195_v19 = vpack.c.bf16 %v168_v13, %v167_v12  ;;  %v204_v20 = vpack.c.bf16 %v186_v15, %v185_v14  ;;  %v644_v22 = vld [vmem:[%s711_s0 + $0x10] sm:$0xff]  ;;  %v86_v41 = vsub.s32 0, %v85_v40  ;;  %v90_v43 = vsub.s32 1, %v85_v40 }
  0x19   :  { %105 = vmatpush1.bf16.msra.mxu0 %v76_v57  ;;  %v32_v21 = vpack.c.bf16 %v636_v18, %v631_v17  ;;  %v649_v23 = vld [vmem:[%s711_s0 + $0x18] sm:$0xff]  ;;  %v169_v25 = vld [vmem:[%s714_s3 + $0x50] sm:$0xff]  ;;  %v187_v27 = vld [vmem:[%s714_s3 + $0xe0] sm:$0xff] }
  0x1a   :  { %106 = vmatprep.subr.bf16.mxu0 %v79_v61  ;;  %v33_v24 = vpack.c.bf16 %v649_v23, %v644_v22  ;;  %v188_v28 = vld [vmem:[%s714_s3 + $0xe8] sm:$0xff]  ;;  %v171_v30 = vld [vmem:[%s714_s3 + $0x60] sm:$0xff]  ;;  %v189_v33 = vld [vmem:[%s714_s3 + $0xf0] sm:$0xff] }
  0x1b   :  { %364 = vmatpush3.bf16.msra.mxu1 %v194_v8  ;;  %v205_v29 = vpack.c.bf16 %v188_v28, %v187_v27  ;;  %v172_v31 = vld [vmem:[%s714_s3 + $0x68] sm:$0xff]  ;;  %v190_v34 = vld [vmem:[%s714_s3 + $0xf8] sm:$0xff]  ;;  %v173_v36 = vld [vmem:[%s714_s3 + $0x70] sm:$0xff] }
  0x1c   :  { %365 = vmatprep.subr.bf16.mxu1 %v203_v11  ;;  %v197_v32 = vpack.c.bf16 %v172_v31, %v171_v30  ;;  %v206_v35 = vpack.c.bf16 %v190_v34, %v189_v33  ;;  %v174_v37 = vld [vmem:[%s714_s3 + $0x78] sm:$0xff]  ;;  %v82_v42 = vld [vmem:[%s713_s2] sm:$0x3] }
  0x1d   :  { %107 = vmatpush1.bf16.msra.mxu0 %v78_v5  ;;  %v198_v38 = vpack.c.bf16 %v174_v37, %v173_v36  ;;  %v87_v44 = vrot.slane %v82_v42, %v86_v41  ;;  %v91_v45 = vrot.slane %v82_v42, %v90_v43  ;;  %v354_v12 = vld [vmem:[%s715_s4] ss:$0 sm:$0xff] }
  0x1e   :  { %108 = vmatprep.subr.bf16.mxu0 %v81_v9 }
  0x1f   :  { %366 = vmatpush3.bf16.msra.mxu1 %v195_v19 }
  0x20   :  { %367 = vmatprep.subr.bf16.mxu1 %v204_v20 }
  0x21   :  { %109 = vmatpush1.bf16.msra.mxu0 %v80_v16 }
  0x24   :  { %127 = vmatmul.mubr.bf16.vlgmr.msra.gmra.mrb[0].mxu0 %v32_v21 }
  0x25   :  { %136 = vmatprep.mubr.bf16.mxu0 %v421_v7  ;;  %v170_v7 = vld [vmem:[%s714_s3 + $0x58] sm:$0xff] }
  0x26   :  { %v196_v26 = vpack.c.bf16 %v170_v7, %v169_v25 }
  0x28   :  { %368 = vmatpush3.bf16.msra.mxu1 %v196_v26 }
  0x29   :  { %369 = vmatprep.subr.bf16.mxu1 %v205_v29 }
  0x2c   :  { %137 = vmatmul.mubr.bf16.gmra.mrb[4].mxu0 %v33_v24  ;;  %370 = vmatpush3.bf16.msra.mxu1 %v197_v32 }
  0x2d   :  { %371 = vmatprep.subr.bf16.mxu1 %v206_v35 }
  0x30   :  { %372 = vmatpush3.bf16.msra.mxu1 %v198_v38 }
  0xf7   :  { %v128_v46 = vpop.f32.mrb[0].mxu0 }
  0xf8   :  { %v129_v47 = vadd.f32 %v128_v46, %v87_v44  ;;  %v130_v48 = vpop.f32.mrb[1].mxu0 }
  0xf9   :  { %v131_v49 = vadd.f32 %v130_v48, %v91_v45  ;;  %v132_v50 = vpop.f32.mrb[2].mxu0 }
  0xfa   :  { %v133_v51 = vadd.f32 %v132_v50, %v87_v44  ;;  %v134_v52 = vpop.f32.mrb[3].mxu0  ;;  %v147_v54 = vmax.f32 %v129_v47, 0.0 }
  0xfb   :  { %v135_v53 = vadd.f32 %v134_v52, %v91_v45  ;;  %v148_v56 = vmax.f32 %v131_v49, 0.0 }
  0xfc   :  { %v149_v55 = vmax.f32 %v133_v51, 0.0 }
  0xfd   :  { %v150_v57 = vmax.f32 %v135_v53, 0.0 }
  0xfe   :  { %v155_v58 = vpack.c.bf16 %v149_v55, %v147_v54 }
  0xff   :  { %v138_v59 = vpop.f32.mrb[4].mxu0  ;;  %v156_v60 = vpack.c.bf16 %v150_v57, %v148_v56 }
 0x100   :  { %v139_v61 = vadd.f32 %v138_v59, %v87_v44  ;;  %v140_v62 = vpop.f32.mrb[5].mxu0  ;;  %v355_v59 = vld [vmem:[%s716_s5] ss:$0 sm:$0xff]  ;;  %s422_s5 = smov [#allocation2]  }
 0x101   :  { %v141_v63 = vadd.f32 %v140_v62, %v91_v45  ;;  %v142_v0 = vpop.f32.mrb[6].mxu0  ;;  %246 = vmatprep.mubr.bf16.mxu1 %v156_v60  ;;  %v356_v62 = vld [vmem:[%s717_s6] ss:$0 sm:$0xff]  ;;  %s343_s24 = sshll.u32 %s422_s5, 4  ;;  %s344_s24 = int_to_ptr.vmem [resolvable:$true] %s343_s24 }
 0x102   :  { %v143_v1 = vadd.f32 %v142_v0, %v87_v44  ;;  %v144_v2 = vpop.f32.mrb[7].mxu0  ;;  %247 = vmatmul.mubr.bf16.vlgmr.msra.gmra.mrb[0].mxu1 %v155_v58  ;;  %v151_v4 = vmax.f32 %v139_v61, 0.0  ;;  %s397_s6 = scalar_lea.vmem %s344_s24, 512  ;;  %p402_p1 = scmp.lt.s32.totalorder %s344_s24, %s344_s24 }
 0x103   :  { %v145_v3 = vadd.f32 %v144_v2, %v91_v45  ;;  %v152_v6 = vmax.f32 %v141_v63, 0.0  ;;  %p398_p0 = scmp.ne.s32.totalorder %s344_s24, %s397_s6  ;;  %p403_p2 = scmp.lt.s32.totalorder %s397_s6, %s397_s6 }
 0x104   :  { %v153_v5 = vmax.f32 %v143_v1, 0.0 }
 0x105   :  { %v154_v8 = vmax.f32 %v145_v3, 0.0  ;;  %p404_p3 = por %p403_p2, %p402_p1 }
 0x106   :  { %v157_v9 = vpack.c.bf16 %v153_v5, %v151_v4 }
 0x107   :  { %v158_v10 = vpack.c.bf16 %v154_v8, %v152_v6  ;;  %p405_p4 = pnand %p404_p3, %p398_p0 }
 0x109   :  { %254 = vmatprep.mubr.bf16.mxu1 %v158_v10 }
 0x10a   :  { %255 = vmatmul.mubr.bf16.gmra.mrb[4].mxu1 %v157_v9 }
 0x1d5   :  { %v373_v11 = vpop.f32.mrb[0].mxu1 }
 0x1d6   :  { %v374_v13 = vpop.f32.mrb[1].mxu1 }
 0x1d7   :  { %v375_v14 = vadd.f32 %v374_v13, %v373_v11  ;;  %v376_v15 = vpop.f32.mrb[2].mxu1 }
 0x1d8   :  { %v377_v16 = vpop.f32.mrb[3].mxu1 }
 0x1d9   :  { %v249_v19 = vadd.f32 %v375_v14, %v354_v12  ;;  %v378_v20 = vadd.f32 %v377_v16, %v376_v15 }
 0x1db   :  { %v252_v21 = vadd.f32 %v378_v20, %v354_v12  ;;  %v263_v24 = vadd.f32 %v249_v19, %v631_v17 }
 0x1dd   :  { %v379_v25 = vpop.f32.mrb[4].mxu1  ;;  %269 = vadd.xlane.f32.xlu0 %v263_v24  ;;  %v264_v28 = vadd.f32 %v252_v21, %v636_v18 }
 0x1de   :  { %v380_v7 = vpop.f32.mrb[5].mxu1 }
 0x1df   :  { %v381_v26 = vadd.f32 %v380_v7, %v379_v25  ;;  %v382_v27 = vpop.f32.mrb[6].mxu1 }
 0x1e0   :  { %v383_v29 = vpop.f32.mrb[7].mxu1 }
 0x1e1   :  { %v257_v30 = vadd.f32 %v381_v26, %v354_v12  ;;  %v384_v31 = vadd.f32 %v383_v29, %v382_v27  ;;  %271 = vadd.xlane.f32.xlu0 %v264_v28 }
 0x1e3   :  { %v260_v32 = vadd.f32 %v384_v31, %v354_v12  ;;  %v265_v33 = vadd.f32 %v257_v30, %v644_v22 }
 0x1e5   :  { %273 = vadd.xlane.f32.xlu1 %v265_v33  ;;  %v266_v34 = vadd.f32 %v260_v32, %v649_v23 }
 0x1e9   :  { %275 = vadd.xlane.f32.xlu1 %v266_v34 }
 0x26a   :  { %v270_v35 = vpop.xlane.xlu0 %269 }
 0x26b   :  { %v278_v17 = vmul.f32 0.0078125, %v270_v35 }
 0x26d   :  { %v282_v36 = vsub.f32 %v263_v24, %v278_v17 }
 0x26e   :  { %v272_v37 = vpop.xlane.xlu0 %271 }
 0x26f   :  { %v279_v38 = vmul.f32 0.0078125, %v272_v37  ;;  %v286_v39 = vmul.f32 %v282_v36, %v282_v36 }
 0x271   :  { %v283_v40 = vsub.f32 %v264_v28, %v279_v38  ;;  %290 = vadd.xlane.f32.xlu0 %v286_v39 }
 0x272   :  { %v274_v18 = vpop.xlane.xlu1 %273 }
 0x273   :  { %v280_v41 = vmul.f32 0.0078125, %v274_v18  ;;  %v287_v42 = vmul.f32 %v283_v40, %v283_v40 }
 0x275   :  { %v284_v43 = vsub.f32 %v265_v33, %v280_v41  ;;  %292 = vadd.xlane.f32.xlu1 %v287_v42 }
 0x276   :  { %v276_v44 = vpop.xlane.xlu1 %275 }
 0x277   :  { %v281_v45 = vmul.f32 0.0078125, %v276_v44  ;;  %v288_v22 = vmul.f32 %v284_v43, %v284_v43 }
 0x279   :  { %v285_v46 = vsub.f32 %v266_v34, %v281_v45  ;;  %294 = vadd.xlane.f32.xlu0 %v288_v22 }
 0x27b   :  { %v289_v23 = vmul.f32 %v285_v46, %v285_v46 }
 0x27d   :  { %296 = vadd.xlane.f32.xlu1 %v289_v23 }
 0x2fe   :  { %v291_v47 = vpop.xlane.xlu0 %290 }
 0x2ff   :  { %v298_v48 = vmul.f32 0.0078125, %v291_v47 }
 0x301   :  { %v302_v49 = vadd.f32 1e-05, %v298_v48 }
 0x302   :  { %v293_v50 = vpop.xlane.xlu1 %292 }
 0x303   :  { %389 = vrsqrt.f32 %v302_v49  ;;  %v299_v51 = vmul.f32 0.0078125, %v293_v50 }
 0x305   :  { %v303_v52 = vadd.f32 1e-05, %v299_v51 }
 0x306   :  { %v295_v53 = vpop.xlane.xlu0 %294 }
 0x307   :  { %391 = vrsqrt.f32 %v303_v52  ;;  %v300_v54 = vmul.f32 0.0078125, %v295_v53 }
 0x309   :  { %v304_v55 = vadd.f32 1e-05, %v300_v54 }
 0x30a   :  { %v297_v56 = vpop.xlane.xlu1 %296 }
 0x30b   :  { %393 = vrsqrt.f32 %v304_v55  ;;  %v301_v57 = vmul.f32 0.0078125, %v297_v56 }
 0x30d   :  { %v390_v58 = vpop.eup %389  ;;  %v305_v60 = vadd.f32 1e-05, %v301_v57 }
 0x30e   :  { %v310_v61 = vmul.f32 %v390_v58, %v282_v36 }
 0x30f   :  { %395 = vrsqrt.f32 %v305_v60 }
 0x310   :  { %v320_v63 = vmul.f32 %v355_v59, %v310_v61 }
 0x311   :  { %v392_v0 = vpop.eup %391 }
 0x312   :  { %v311_v1 = vmul.f32 %v392_v0, %v283_v40  ;;  %v330_v2 = vadd.f32 %v356_v62, %v320_v63 }
 0x314   :  { %v321_v3 = vmul.f32 %v355_v59, %v311_v1  ;;  %334 = vst [vmem:[#allocation2] sm:$0xff] %v330_v2 }
 0x315   :  { %v394_v4 = vpop.eup %393 }
 0x316   :  { %v312_v5 = vmul.f32 %v394_v4, %v284_v43  ;;  %v331_v6 = vadd.f32 %v356_v62, %v321_v3 }
 0x318   :  { %v322_v8 = vmul.f32 %v355_v59, %v312_v5  ;;  %335 = vst [vmem:[#allocation2 + $0x8] sm:$0xff] %v331_v6 }
 0x319   :  { %v396_v9 = vpop.eup %395 }
 0x31a   :  { %v332_v10 = vadd.f32 %v356_v62, %v322_v8  ;;  %v313_v11 = vmul.f32 %v396_v9, %v285_v46 }
 0x31c   :  { %336 = vst [vmem:[#allocation2 + $0x10] sm:$0xff] %v332_v10  ;;  %v323_v12 = vmul.f32 %v355_v59, %v313_v11 }
 0x31e   :  { %v333_v13 = vadd.f32 %v356_v62, %v323_v12 }
 0x320   :  { %337 = vst [vmem:[#allocation2 + $0x18] sm:$0xff] %v333_v13 }
 0x321   :  { %408 = shalt.err (!%p405_p4)
}
 0x322   :  { %s409_s27 = scalar_lea.hbm %s718_s7, 512 }
 0x323   :  { %p410_p5 = scmp.ne.s32.totalorder %s718_s7, %s409_s27  ;;  %p413_p6 = scmp.lt.u32.totalorder %s409_s27, %s718_s7 }
 0x325   :  { %p415_p7 = pnand %p413_p6, %p410_p5 }
 0x327   :  { %418 = shalt.err (!%p415_p7)
}
 0x328   :  { %s423_s8 = smov 128   ;;  %s424_s9 = smov 8  }
 0x329   :  { %349 = dma.vmem_to_hbm [thread:$0]  %s344_s24, 512, %s718_s7, [#allocation3], %s423_s8, %s423_s8, %s424_s9  }
 0x32a   :  { %419 = dma.done.wait [#allocation3], 512  }
 0x32b   :  { %420 = vsyncadd [#allocation3], 4294966784 }
 0x32c   :  { %353 = vsyncpa [#allocation3], 1 }

</bundles_post_ra>
